<compile_context>
chip_gen: v7x
topology: tpu7x:2x2x1
jax: 0.10.0
libtpu: 0.0.40
codegen_flags: <defaults>
</compile_context>

<pallas_src>
import functools
import math

import numpy as np

import jax
import jax.numpy as jnp
from jax.experimental import pallas as pl
from jax.experimental.pallas import tpu as pltpu

F32 = jnp.float32


# -----------------------------------------------------------------------------
# Small helpers
# -----------------------------------------------------------------------------

def _norm_adj(a):
    """torch: A @ diag(1/(sum(A, 0) + 0.001))  -> scale each column."""
    col = jnp.sum(a, axis=0)
    return a * (1.0 / (col + 0.001))[None, :]


def spatial_pe(c, v):
    # TODO(synk): PositionalEncoding is not defined in the reference source; use a
    # deterministic sinusoidal spatial PE (per channel / joint) as a stand-in.
    pos = jnp.arange(v, dtype=F32)[None, :]
    ch = jnp.arange(c, dtype=F32)[:, None]
    div = jnp.power(10000.0, (2.0 * jnp.floor(ch / 2.0)) / float(c))
    ang = pos / div
    return jnp.where((jnp.arange(c)[:, None] % 2) == 0, jnp.sin(ang), jnp.cos(ang))


def bn_eval_affine(c, weight):
    """Eval-mode BatchNorm (running mean 0, var 1) as a per-channel affine."""
    eps = 1e-5
    return (jnp.full((c,), weight / math.sqrt(1.0 + eps), F32),
            jnp.zeros((c,), F32))


def _bcast_spec(a):
    """Full-array block that is identical for every grid step (fetched once)."""
    return pl.BlockSpec(a.shape, lambda i, nd=a.ndim: (0,) * nd)


def _pick_b_tile(n):
    """Largest batch tile <= 8 that keeps the grid length >= 2 (megacore)."""
    cands = [b for b in range(1, min(8, n) + 1) if n % b == 0 and n // b >= 2]
    return max(cands) if cands else n


# -----------------------------------------------------------------------------
# The fused unit_gcn kernel (transposed (V, C*T) layout)
# -----------------------------------------------------------------------------

def _unit_gcn_kernel(x_ref, wblk_ref, adjT_ref, off_ref, aff_ref,
                     wpool_ref, bfc_ref, wbr_ref, bbr_ref, o_ref,
                     *, ct, it, has_down, b_tile):
    f32 = jnp.float32
    wblk = wblk_ref[...]                 # (Cin*T, 2*IT + {6,7}*CT)  kron'd 1x1 convs
    adjT = adjT_ref[...]                 # (5, V, V)  normalised, transposed graphs
    off = off_ref[...]                   # (V, 2*IT)  PE+bias offsets for theta/phi
    aff = aff_ref[...]                   # (8, CT)    per-channel lane affines
    base = 2 * it

    for b in range(b_tile):
        xb = x_ref[b]                                            # (V, Cin*T)

        # every 1x1 conv of the block as ONE lane-dense matmul in (V, C*T) layout
        h = jnp.dot(xb, wblk, preferred_element_type=f32)

        def blk(k):
            return h[:, base + k * ct: base + (k + 1) * ct]      # (V, CT), 128-aligned

        # graph branches: A^T @ X^T, bias as lane vectors broadcast over sublanes
        x_j = (jnp.dot(adjT[0], blk(0), preferred_element_type=f32)
               + jnp.dot(adjT[1], blk(1), preferred_element_type=f32)
               + jnp.dot(adjT[2], blk(2), preferred_element_type=f32)
               + aff[0:1, :])
        x_p = jnp.dot(adjT[3], blk(3), preferred_element_type=f32) + aff[1:2, :]
        x_b = jnp.dot(adjT[4], blk(4), preferred_element_type=f32) + aff[2:3, :]

        # non-local joint attention; 1/(inter*T) is folded into the theta weights
        tp = h[:, 0:2 * it] + off                                # (V, 2*IT)
        theta = tp[:, 0:it]                                      # (V, IT)
        phi = tp[:, it:2 * it]                                   # (V, IT)
        # St[v', v] = scores[v, v']; softmax over v (lane axis)
        st = jax.lax.dot_general(phi, theta, (((1,), (1,)), ((), ())),
                                 preferred_element_type=f32)     # (V, V)
        st = st - jnp.max(st, axis=-1, keepdims=True)
        ex = jnp.exp(st)
        attT = ex * pl.reciprocal(jnp.sum(ex, axis=-1, keepdims=True), approx=False)
        x_nl = jnp.dot(attT, blk(5), preferred_element_type=f32) + aff[3:4, :]

        # SelectScale squeeze/excite: the (T,V) mean-pool and the per-channel
        # branch expansion are folded into wpool / wbr host-side (no repeat mats)
        x_sum = x_j + x_p + x_b
        srow = jnp.sum(x_sum, axis=0, keepdims=True)             # (1, CT)
        z = jnp.dot(srow, wpool_ref[...], preferred_element_type=f32) + bfc_ref[...]
        vrow = jnp.dot(z, wbr_ref[...], preferred_element_type=f32) + bbr_ref[...]
        v0 = vrow[:, 0:ct]
        v1 = vrow[:, ct:2 * ct]
        v2 = vrow[:, 2 * ct:3 * ct]
        m = jnp.maximum(jnp.maximum(v0, v1), v2)
        e0, e1, e2 = jnp.exp(v0 - m), jnp.exp(v1 - m), jnp.exp(v2 - m)
        inv = pl.reciprocal(e0 + e1 + e2, approx=False)
        sel = (e0 * inv) * x_j + (e1 * inv) * x_p + (e2 * inv) * x_b

        # BatchNorm epilogue, residual (down-conv affine or identity), ReLU
        y = aff[4:5, :] * (sel + x_nl) + aff[5:6, :]
        if has_down:
            res = aff[6:7, :] * blk(6) + aff[7:8, :]
        else:
            res = xb                                             # Cin == Cout here
        o_ref[b] = jnp.maximum(y + res, 0.0)


# -----------------------------------------------------------------------------
# Host-side weight folding (done once per parameter set, outside jit)
# -----------------------------------------------------------------------------

def _prepare_unit_gcn(params, t):
    w_j = [params["conv_joint"][i][0] for i in range(3)]
    b_j = [params["conv_joint"][i][1] for i in range(3)]
    cout, cin = w_j[0].shape
    inter = params["conv_theta"][0].shape[0]
    v = params["A_base"].shape[-1]
    ct, it = cout * t, inter * t
    has_down = params["down"] is not None

    eye_t = jnp.eye(t, dtype=F32)
    rep = lambda vec: jnp.repeat(vec.astype(F32), t)                 # (C,) -> (C*T,)
    kr = lambda w, s=1.0: jnp.kron(w.T.astype(F32) * s, eye_t)       # (Cin*T, Co*T)

    # normalised adjacencies, transposed for the (V, C*T) layout
    a_full = params["A_base"] + params["PA"]
    adjT = jnp.stack([_norm_adj(a_full[0]).T, _norm_adj(a_full[1]).T,
                      _norm_adj(a_full[2]).T,
                      _norm_adj(params["G_part"]).T,
                      _norm_adj(params["G_body"]).T], axis=0)        # (5, V, V)

    # all 1x1 convs as one block-diagonal weight; attention scale folded into theta
    inv_it = 1.0 / float(it)
    blocks = [kr(params["conv_theta"][0], inv_it), kr(params["conv_phi"][0]),
              kr(w_j[0]), kr(w_j[1]), kr(w_j[2]),
              kr(params["conv_part"][0]), kr(params["conv_body"][0]),
              kr(params["conv_nonlocal"][0])]
    if has_down:
        blocks.append(kr(params["down"]["conv"][0]))
    wblk = jnp.concatenate(blocks, axis=1)                           # (Cin*T, RT)

    # PE contribution + biases of theta/phi as lane-dense offsets (constant over T)
    pe = params["pe"]
    th_off = (params["conv_theta"][0] @ pe + params["conv_theta"][1][:, None]) * inv_it
    ph_off = params["conv_phi"][0] @ pe + params["conv_phi"][1][:, None]
    off = jnp.concatenate([jnp.repeat(th_off.T, t, axis=1),
                           jnp.repeat(ph_off.T, t, axis=1)], axis=1)  # (V, 2*IT)

    # per-channel affines as lane vectors
    bn_s, bn_t = params["bn"]
    if has_down:
        d_s, d_t = params["down"]["bn"]
        res_s = d_s
        res_t = d_s * params["down"]["conv"][1] + d_t
    else:
        res_s = jnp.zeros((cout,), F32)
        res_t = jnp.zeros((cout,), F32)
    aff = jnp.stack([rep(b_j[0] + b_j[1] + b_j[2]),
                     rep(params["conv_part"][1]), rep(params["conv_body"][1]),
                     rep(params["conv_nonlocal"][1]),
                     rep(bn_s), rep(bn_t), rep(res_s), rep(res_t)], axis=0)  # (8, CT)

    # SelectScale FCs with the (T,V) pooling / per-channel expansion folded in
    fc_w, fc_b = params["fc"]
    wpool = jnp.repeat(fc_w.T, t, axis=0) * (1.0 / float(t * v))     # (CT, d)
    bfc = fc_b[None, :]                                              # (1, d)
    wbr = jnp.concatenate([jnp.repeat(params["fc_branch"][k][0], t, axis=0).T
                           for k in range(3)], axis=1)               # (d, 3*CT)
    bbr = jnp.concatenate([rep(params["fc_branch"][k][1])
                           for k in range(3)])[None, :]              # (1, 3*CT)

    prep = dict(adjT=adjT, wblk=wblk, off=off, aff=aff,
                wpool=wpool, bfc=bfc, wbr=wbr, bbr=bbr)
    cfg = dict(cin=cin, cout=cout, t=t, v=v, ct=ct, it=it, has_down=has_down)
    return prep, cfg


def make_unit_gcn(params, t):
    """Returns (jitted apply(prep, x), prep) for one unit_gcn layer."""
    prep, cfg = _prepare_unit_gcn(params, t)

    def apply(prep, x):
        n, cin, t_, v = x.shape
        assert cin == cfg["cin"] and t_ == cfg["t"] and v == cfg["v"]
        ct, it = cfg["ct"], cfg["it"]
        b_tile = _pick_b_tile(n)

        # tiny input transpose to the lane-dense (V, Cin*T) working layout
        xt = jnp.transpose(x, (0, 3, 1, 2)).reshape(n, v, cin * t_)

        kern = functools.partial(_unit_gcn_kernel, ct=ct, it=it,
                                 has_down=cfg["has_down"], b_tile=b_tile)
        yt = pl.pallas_call(
            kern,
            out_shape=jax.ShapeDtypeStruct((n, v, ct), F32),
            grid=(n // b_tile,),
            in_specs=[
                pl.BlockSpec((b_tile, v, cin * t_), lambda i: (i, 0, 0)),
                _bcast_spec(prep["wblk"]), _bcast_spec(prep["adjT"]),
                _bcast_spec(prep["off"]), _bcast_spec(prep["aff"]),
                _bcast_spec(prep["wpool"]), _bcast_spec(prep["bfc"]),
                _bcast_spec(prep["wbr"]), _bcast_spec(prep["bbr"]),
            ],
            out_specs=pl.BlockSpec((b_tile, v, ct), lambda i: (i, 0, 0)),
            compiler_params=pltpu.CompilerParams(
                dimension_semantics=("parallel",)),
        )(xt, prep["wblk"], prep["adjT"], prep["off"], prep["aff"],
          prep["wpool"], prep["bfc"], prep["wbr"], prep["bbr"])

        # lane-dense kernel output back to the module's (N, C, T, V) layout
        return jnp.transpose(yt, (0, 2, 1)).reshape(n, cfg["cout"], t_, v)

    return jax.jit(apply), prep


# -----------------------------------------------------------------------------
# Pure-XLA reference of the same forward (mirrors the PyTorch module literally)
# -----------------------------------------------------------------------------

def unit_gcn_reference(params, x):
    n, cin, t, v = x.shape
    inter = params["conv_theta"][0].shape[0]

    def conv(w, b, t4):
        return jnp.einsum("oc,nctv->notv", w, t4) + b[None, :, None, None]

    a_full = params["A_base"] + params["PA"]
    x_v = x.reshape(n, cin * t, v)

    x_joint = None
    for i in range(3):
        xg = jnp.matmul(x_v, _norm_adj(a_full[i])).reshape(n, cin, t, v)
        z = conv(*params["conv_joint"][i], xg)
        x_joint = z if x_joint is None else x_joint + z

    x_pe = x + params["pe"][None, :, None, :]
    theta = conv(*params["conv_theta"], x_pe)
    phi = conv(*params["conv_phi"], x_pe)
    theta = jnp.transpose(theta, (0, 3, 1, 2)).reshape(n, v, inter * t)
    phi = phi.reshape(n, inter * t, v)
    att = jax.nn.softmax(jnp.matmul(theta, phi) / float(inter * t), axis=-2)
    x_nl = jnp.matmul(x_v, att).reshape(n, cin, t, v)
    x_nl = conv(*params["conv_nonlocal"], x_nl)

    xg = jnp.matmul(x_v, _norm_adj(params["G_part"])).reshape(n, cin, t, v)
    x_part = conv(*params["conv_part"], xg)
    xg = jnp.matmul(x_v, _norm_adj(params["G_body"])).reshape(n, cin, t, v)
    x_body = conv(*params["conv_body"], xg)

    x_sum = x_joint + x_part + x_body
    glo = x_sum.mean(-1).mean(-1)
    fw, fb = params["fc"]
    z = glo @ fw.T + fb
    vecs = jnp.stack([z @ params["fc_branch"][i][0].T + params["fc_branch"][i][1]
                      for i in range(3)], axis=1)
    a = jax.nn.softmax(vecs, axis=1)[:, :, :, None, None]
    x_sel = a[:, 0] * x_joint + a[:, 1] * x_part + a[:, 2] * x_body

    s, sh = params["bn"]
    y = (x_sel + x_nl) * s[None, :, None, None] + sh[None, :, None, None]
    if params["down"] is not None:
        res = conv(*params["down"]["conv"], x)
        ds_, dt_ = params["down"]["bn"]
        res = res * ds_[None, :, None, None] + dt_[None, :, None, None]
    else:
        res = x
    return jnp.maximum(y + res, 0.0)


# -----------------------------------------------------------------------------
# Deterministic parameter construction
# -----------------------------------------------------------------------------

def init_unit_gcn_params(key, cin, cout, v, a_base, g_part, g_body):
    inter = cout // 4
    d = cout // 2
    keys = iter(jax.random.split(key, 40))

    def conv(ci, co, std):
        return (std * jax.random.normal(next(keys), (co, ci), F32),
                0.05 * jax.random.normal(next(keys), (co,), F32))

    branch_std = math.sqrt(2.0 / (cout * cin * 1 * 3))      # conv_branch_init
    kaiming = lambda co: math.sqrt(2.0 / co)                 # conv_init (fan_out, 1x1)

    params = {
        "A_base": a_base,
        "PA": jnp.full((3, v, v), 1e-6, F32),
        "G_part": g_part,
        "G_body": g_body,
        "pe": spatial_pe(cin, v),
        "conv_joint": [conv(cin, cout, branch_std) for _ in range(3)],
        "conv_theta": conv(cin, inter, kaiming(inter)),
        "conv_phi": conv(cin, inter, kaiming(inter)),
        "conv_nonlocal": conv(cin, cout, kaiming(cout)),
        "conv_part": conv(cin, cout, kaiming(cout)),
        "conv_body": conv(cin, cout, kaiming(cout)),
        "fc": ((1.0 / math.sqrt(cout)) * jax.random.normal(next(keys), (d, cout), F32),
               0.05 * jax.random.normal(next(keys), (d,), F32)),
        "fc_branch": [((1.0 / math.sqrt(d)) * jax.random.normal(next(keys), (cout, d), F32),
                       0.05 * jax.random.normal(next(keys), (cout,), F32))
                      for _ in range(3)],
        "bn": bn_eval_affine(cout, 1e-6),                   # bn_init(self.bn, 1e-6)
        "down": None if cin == cout else {"conv": conv(cin, cout, kaiming(cout)),
                                          "bn": bn_eval_affine(cout, 1.0)},
    }
    return params


# -----------------------------------------------------------------------------
# Main
# -----------------------------------------------------------------------------

if __name__ == "__main__":
    N, C_IN, C_OUT, T, V = 2, 3, 16, 16, 25

    root = jax.random.PRNGKey(0)
    k_x, k_graph, k_p1, k_p2 = jax.random.split(root, 4)

    # TODO(synk): Graph / generate_G_part / generate_G_body are not provided;
    #             synthetic deterministic skeleton graphs are used.
    eye = jnp.eye(V, dtype=F32)
    kg1, kg2, kg3 = jax.random.split(k_graph, 3)
    a_in = jnp.tril((jax.random.uniform(kg1, (V, V)) < 0.15).astype(F32), -1)
    A_base = jnp.stack([eye, a_in, a_in.T], axis=0)
    G_part = eye + (jax.random.uniform(kg2, (V, V)) < 0.2).astype(F32)
    G_body = eye + (jax.random.uniform(kg3, (V, V)) < 0.1).astype(F32)

    x = jax.random.normal(k_x, (N, C_IN, T, V), dtype=F32)

    p1 = init_unit_gcn_params(k_p1, C_IN, C_OUT, V, A_base, G_part, G_body)   # down path
    p2 = init_unit_gcn_params(k_p2, C_OUT, C_OUT, V, A_base, G_part, G_body)  # identity res

    fwd1, prep1 = make_unit_gcn(p1, T)
    fwd2, prep2 = make_unit_gcn(p2, T)
    y1 = jax.block_until_ready(fwd1(prep1, x))
    y2 = jax.block_until_ready(fwd2(prep2, y1))

    assert y1.shape == (N, C_OUT, T, V), y1.shape
    assert y2.shape == (N, C_OUT, T, V), y2.shape
    assert bool(jnp.all(jnp.isfinite(y1))) and bool(jnp.all(jnp.isfinite(y2)))

    # verify against a plain-XLA reference of the same forward pass
    ref = jax.jit(unit_gcn_reference)
    r1 = jax.block_until_ready(ref(p1, x))
    r2 = jax.block_until_ready(ref(p2, y1))
    np.testing.assert_allclose(np.asarray(y1), np.asarray(r1), rtol=5e-4, atol=5e-4)
    np.testing.assert_allclose(np.asarray(y2), np.asarray(r2), rtol=5e-4, atol=5e-4)

    # the module's default bn weight (1e-6) makes the main branch nearly invisible,
    # so also validate the fused graph/attention/SelectScale math with bn weight = 1.
    p1nb = dict(p1)
    p1nb["bn"] = bn_eval_affine(C_OUT, 1.0)
    fwd1nb, prep1nb = make_unit_gcn(p1nb, T)
    y1nb = jax.block_until_ready(fwd1nb(prep1nb, x))
    r1nb = jax.block_until_ready(jax.jit(unit_gcn_reference)(p1nb, x))
    np.testing.assert_allclose(np.asarray(y1nb), np.asarray(r1nb), rtol=5e-4, atol=5e-4)

    print("KERNEL_OK")
</pallas_src>

<mosaic_0001>
module attributes {stable_mosaic.version = 11 : i64} {
  func.func @_unit_gcn_kernel(%arg0: i32, %arg1: memref<1x25x48xf32, #tpu.memory_space<vmem>>, %arg2: memref<48x1920xf32, #tpu.memory_space<vmem>>, %arg3: memref<5x25x25xf32, #tpu.memory_space<vmem>>, %arg4: memref<25x128xf32, #tpu.memory_space<vmem>>, %arg5: memref<8x256xf32, #tpu.memory_space<vmem>>, %arg6: memref<256x8xf32, #tpu.memory_space<vmem>>, %arg7: memref<1x8xf32, #tpu.memory_space<vmem>>, %arg8: memref<8x768xf32, #tpu.memory_space<vmem>>, %arg9: memref<1x768xf32, #tpu.memory_space<vmem>>, %arg10: memref<1x25x256xf32, #tpu.memory_space<vmem>>) attributes {dimension_semantics = [#tpu.dimension_semantics<parallel>], iteration_bounds = array<i64: 2>, scalar_prefetch = 0 : i64, scratch_operands = 0 : i64, tpu.core_type = #tpu.core_type<tc>, window_params = [{transform_indices = @transform_0, window_bounds = array<i64: 1, 25, 48>}, {pipeline_mode = #tpu.pipeline_mode<synchronous>, transform_indices = @transform_1, window_bounds = array<i64: 48, 1920>}, {pipeline_mode = #tpu.pipeline_mode<synchronous>, transform_indices = @transform_2, window_bounds = array<i64: 5, 25, 25>}, {pipeline_mode = #tpu.pipeline_mode<synchronous>, transform_indices = @transform_3, window_bounds = array<i64: 25, 128>}, {pipeline_mode = #tpu.pipeline_mode<synchronous>, transform_indices = @transform_4, window_bounds = array<i64: 8, 256>}, {pipeline_mode = #tpu.pipeline_mode<synchronous>, transform_indices = @transform_5, window_bounds = array<i64: 256, 8>}, {pipeline_mode = #tpu.pipeline_mode<synchronous>, transform_indices = @transform_6, window_bounds = array<i64: 1, 8>}, {pipeline_mode = #tpu.pipeline_mode<synchronous>, transform_indices = @transform_7, window_bounds = array<i64: 8, 768>}, {pipeline_mode = #tpu.pipeline_mode<synchronous>, transform_indices = @transform_8, window_bounds = array<i64: 1, 768>}, {transform_indices = @transform_9, window_bounds = array<i64: 1, 25, 256>}]} {
    %c0 = arith.constant 0 : index
    %c0_0 = arith.constant 0 : index
    %0 = vector.load %arg2[%c0, %c0_0] : memref<48x1920xf32, #tpu.memory_space<vmem>>, vector<48x1920xf32>
    %c0_1 = arith.constant 0 : index
    %c0_2 = arith.constant 0 : index
    %c0_3 = arith.constant 0 : index
    %1 = vector.load %arg3[%c0_1, %c0_2, %c0_3] : memref<5x25x25xf32, #tpu.memory_space<vmem>>, vector<5x25x25xf32>
    %c0_4 = arith.constant 0 : index
    %c0_5 = arith.constant 0 : index
    %2 = vector.load %arg4[%c0_4, %c0_5] : memref<25x128xf32, #tpu.memory_space<vmem>>, vector<25x128xf32>
    %c0_6 = arith.constant 0 : index
    %c0_7 = arith.constant 0 : index
    %3 = vector.load %arg5[%c0_6, %c0_7] : memref<8x256xf32, #tpu.memory_space<vmem>>, vector<8x256xf32>
    %c0_8 = arith.constant 0 : index
    %c0_9 = arith.constant 0 : index
    %c0_10 = arith.constant 0 : index
    %4 = vector.load %arg1[%c0_8, %c0_9, %c0_10] : memref<1x25x48xf32, #tpu.memory_space<vmem>>, vector<1x25x48xf32>
    %5 = vector.shape_cast %4 : vector<1x25x48xf32> to vector<25x48xf32>
    %cst = arith.constant dense<0.000000e+00> : vector<25x1920xf32>
    %6 = tpu.matmul %5, %0, %cst {dimension_numbers = #tpu.dot_dimension_numbers<[1], [0], [0], [1], [0, 0, 1, 1], [], []>} : vector<25x48xf32>, vector<48x1920xf32>, vector<25x1920xf32> -> vector<25x1920xf32>
    %7 = vector.extract_strided_slice %1 {offsets = [0, 0, 0], sizes = [1, 25, 25], strides = [1, 1, 1]} : vector<5x25x25xf32> to vector<1x25x25xf32>
    %8 = vector.shape_cast %7 : vector<1x25x25xf32> to vector<25x25xf32>
    %9 = vector.extract_strided_slice %6 {offsets = [0, 128], sizes = [25, 256], strides = [1, 1]} : vector<25x1920xf32> to vector<25x256xf32>
    %cst_11 = arith.constant dense<0.000000e+00> : vector<25x256xf32>
    %10 = tpu.matmul %8, %9, %cst_11 {dimension_numbers = #tpu.dot_dimension_numbers<[1], [0], [0], [1], [0, 0, 1, 1], [], []>} : vector<25x25xf32>, vector<25x256xf32>, vector<25x256xf32> -> vector<25x256xf32>
    %11 = vector.extract_strided_slice %1 {offsets = [1, 0, 0], sizes = [1, 25, 25], strides = [1, 1, 1]} : vector<5x25x25xf32> to vector<1x25x25xf32>
    %12 = vector.shape_cast %11 : vector<1x25x25xf32> to vector<25x25xf32>
    %13 = vector.extract_strided_slice %6 {offsets = [0, 384], sizes = [25, 256], strides = [1, 1]} : vector<25x1920xf32> to vector<25x256xf32>
    %cst_12 = arith.constant dense<0.000000e+00> : vector<25x256xf32>
    %14 = tpu.matmul %12, %13, %cst_12 {dimension_numbers = #tpu.dot_dimension_numbers<[1], [0], [0], [1], [0, 0, 1, 1], [], []>} : vector<25x25xf32>, vector<25x256xf32>, vector<25x256xf32> -> vector<25x256xf32>
    %15 = arith.addf %10, %14 : vector<25x256xf32>
    %16 = vector.extract_strided_slice %1 {offsets = [2, 0, 0], sizes = [1, 25, 25], strides = [1, 1, 1]} : vector<5x25x25xf32> to vector<1x25x25xf32>
    %17 = vector.shape_cast %16 : vector<1x25x25xf32> to vector<25x25xf32>
    %18 = vector.extract_strided_slice %6 {offsets = [0, 640], sizes = [25, 256], strides = [1, 1]} : vector<25x1920xf32> to vector<25x256xf32>
    %cst_13 = arith.constant dense<0.000000e+00> : vector<25x256xf32>
    %19 = tpu.matmul %17, %18, %cst_13 {dimension_numbers = #tpu.dot_dimension_numbers<[1], [0], [0], [1], [0, 0, 1, 1], [], []>} : vector<25x25xf32>, vector<25x256xf32>, vector<25x256xf32> -> vector<25x256xf32>
    %20 = arith.addf %15, %19 : vector<25x256xf32>
    %21 = vector.extract_strided_slice %3 {offsets = [0, 0], sizes = [1, 256], strides = [1, 1]} : vector<8x256xf32> to vector<1x256xf32>
    %22 = vector.broadcast %21 : vector<1x256xf32> to vector<25x256xf32>
    %23 = arith.addf %20, %22 : vector<25x256xf32>
    %24 = vector.extract_strided_slice %1 {offsets = [3, 0, 0], sizes = [1, 25, 25], strides = [1, 1, 1]} : vector<5x25x25xf32> to vector<1x25x25xf32>
    %25 = vector.shape_cast %24 : vector<1x25x25xf32> to vector<25x25xf32>
    %26 = vector.extract_strided_slice %6 {offsets = [0, 896], sizes = [25, 256], strides = [1, 1]} : vector<25x1920xf32> to vector<25x256xf32>
    %cst_14 = arith.constant dense<0.000000e+00> : vector<25x256xf32>
    %27 = tpu.matmul %25, %26, %cst_14 {dimension_numbers = #tpu.dot_dimension_numbers<[1], [0], [0], [1], [0, 0, 1, 1], [], []>} : vector<25x25xf32>, vector<25x256xf32>, vector<25x256xf32> -> vector<25x256xf32>
    %28 = vector.extract_strided_slice %3 {offsets = [1, 0], sizes = [1, 256], strides = [1, 1]} : vector<8x256xf32> to vector<1x256xf32>
    %29 = vector.broadcast %28 : vector<1x256xf32> to vector<25x256xf32>
    %30 = arith.addf %27, %29 : vector<25x256xf32>
    %31 = vector.extract_strided_slice %1 {offsets = [4, 0, 0], sizes = [1, 25, 25], strides = [1, 1, 1]} : vector<5x25x25xf32> to vector<1x25x25xf32>
    %32 = vector.shape_cast %31 : vector<1x25x25xf32> to vector<25x25xf32>
    %33 = vector.extract_strided_slice %6 {offsets = [0, 1152], sizes = [25, 256], strides = [1, 1]} : vector<25x1920xf32> to vector<25x256xf32>
    %cst_15 = arith.constant dense<0.000000e+00> : vector<25x256xf32>
    %34 = tpu.matmul %32, %33, %cst_15 {dimension_numbers = #tpu.dot_dimension_numbers<[1], [0], [0], [1], [0, 0, 1, 1], [], []>} : vector<25x25xf32>, vector<25x256xf32>, vector<25x256xf32> -> vector<25x256xf32>
    %35 = vector.extract_strided_slice %3 {offsets = [2, 0], sizes = [1, 256], strides = [1, 1]} : vector<8x256xf32> to vector<1x256xf32>
    %36 = vector.broadcast %35 : vector<1x256xf32> to vector<25x256xf32>
    %37 = arith.addf %34, %36 : vector<25x256xf32>
    %38 = vector.extract_strided_slice %6 {offsets = [0, 0], sizes = [25, 128], strides = [1, 1]} : vector<25x1920xf32> to vector<25x128xf32>
    %39 = arith.addf %38, %2 : vector<25x128xf32>
    %40 = vector.extract_strided_slice %39 {offsets = [0, 0], sizes = [25, 64], strides = [1, 1]} : vector<25x128xf32> to vector<25x64xf32>
    %41 = vector.extract_strided_slice %39 {offsets = [0, 64], sizes = [25, 64], strides = [1, 1]} : vector<25x128xf32> to vector<25x64xf32>
    %cst_16 = arith.constant dense<0.000000e+00> : vector<25x25xf32>
    %42 = tpu.matmul %41, %40, %cst_16 {dimension_numbers = #tpu.dot_dimension_numbers<[1], [1], [0], [0], [0, 0, 1, 0], [], []>} : vector<25x64xf32>, vector<25x64xf32>, vector<25x25xf32> -> vector<25x25xf32>
    %cst_17 = arith.constant dense<0xFF800000> : vector<25xf32>
    %43 = vector.multi_reduction <maximumf>, %42, %cst_17 [1] : vector<25x25xf32> to vector<25xf32>
    %44 = vector.shape_cast %43 : vector<25xf32> to vector<25x1xf32>
    %45 = vector.broadcast %44 : vector<25x1xf32> to vector<25x25xf32>
    %46 = arith.subf %42, %45 : vector<25x25xf32>
    %47 = math.exp %46 : vector<25x25xf32>
    %cst_18 = arith.constant dense<0.000000e+00> : vector<25xf32>
    %48 = vector.multi_reduction <add>, %47, %cst_18 [1] : vector<25x25xf32> to vector<25xf32>
    %49 = vector.shape_cast %48 : vector<25xf32> to vector<25x1xf32>
    %50 = tpu.reciprocal %49 : vector<25x1xf32> -> vector<25x1xf32>
    %51 = vector.broadcast %50 : vector<25x1xf32> to vector<25x25xf32>
    %52 = arith.mulf %47, %51 : vector<25x25xf32>
    %53 = vector.extract_strided_slice %6 {offsets = [0, 1408], sizes = [25, 256], strides = [1, 1]} : vector<25x1920xf32> to vector<25x256xf32>
    %cst_19 = arith.constant dense<0.000000e+00> : vector<25x256xf32>
    %54 = tpu.matmul %52, %53, %cst_19 {dimension_numbers = #tpu.dot_dimension_numbers<[1], [0], [0], [1], [0, 0, 1, 1], [], []>} : vector<25x25xf32>, vector<25x256xf32>, vector<25x256xf32> -> vector<25x256xf32>
    %55 = vector.extract_strided_slice %3 {offsets = [3, 0], sizes = [1, 256], strides = [1, 1]} : vector<8x256xf32> to vector<1x256xf32>
    %56 = vector.broadcast %55 : vector<1x256xf32> to vector<25x256xf32>
    %57 = arith.addf %54, %56 : vector<25x256xf32>
    %58 = arith.addf %23, %30 : vector<25x256xf32>
    %59 = arith.addf %58, %37 : vector<25x256xf32>
    %cst_20 = arith.constant dense<0.000000e+00> : vector<256xf32>
    %60 = vector.multi_reduction <add>, %59, %cst_20 [0] : vector<25x256xf32> to vector<256xf32>
    %61 = vector.shape_cast %60 : vector<256xf32> to vector<1x256xf32>
    %c0_21 = arith.constant 0 : index
    %c0_22 = arith.constant 0 : index
    %62 = vector.load %arg6[%c0_21, %c0_22] : memref<256x8xf32, #tpu.memory_space<vmem>>, vector<256x8xf32>
    %cst_23 = arith.constant dense<0.000000e+00> : vector<1x8xf32>
    %63 = tpu.matmul %61, %62, %cst_23 {dimension_numbers = #tpu.dot_dimension_numbers<[1], [0], [0], [1], [0, 0, 1, 1], [], []>} : vector<1x256xf32>, vector<256x8xf32>, vector<1x8xf32> -> vector<1x8xf32>
    %c0_24 = arith.constant 0 : index
    %c0_25 = arith.constant 0 : index
    %64 = vector.load %arg7[%c0_24, %c0_25] : memref<1x8xf32, #tpu.memory_space<vmem>>, vector<1x8xf32>
    %65 = arith.addf %63, %64 : vector<1x8xf32>
    %c0_26 = arith.constant 0 : index
    %c0_27 = arith.constant 0 : index
    %66 = vector.load %arg8[%c0_26, %c0_27] : memref<8x768xf32, #tpu.memory_space<vmem>>, vector<8x768xf32>
    %cst_28 = arith.constant dense<0.000000e+00> : vector<1x768xf32>
    %67 = tpu.matmul %65, %66, %cst_28 {dimension_numbers = #tpu.dot_dimension_numbers<[1], [0], [0], [1], [0, 0, 1, 1], [], []>} : vector<1x8xf32>, vector<8x768xf32>, vector<1x768xf32> -> vector<1x768xf32>
    %c0_29 = arith.constant 0 : index
    %c0_30 = arith.constant 0 : index
    %68 = vector.load %arg9[%c0_29, %c0_30] : memref<1x768xf32, #tpu.memory_space<vmem>>, vector<1x768xf32>
    %69 = arith.addf %67, %68 : vector<1x768xf32>
    %70 = vector.extract_strided_slice %69 {offsets = [0, 0], sizes = [1, 256], strides = [1, 1]} : vector<1x768xf32> to vector<1x256xf32>
    %71 = vector.extract_strided_slice %69 {offsets = [0, 256], sizes = [1, 256], strides = [1, 1]} : vector<1x768xf32> to vector<1x256xf32>
    %72 = vector.extract_strided_slice %69 {offsets = [0, 512], sizes = [1, 256], strides = [1, 1]} : vector<1x768xf32> to vector<1x256xf32>
    %73 = arith.maximumf %70, %71 : vector<1x256xf32>
    %74 = arith.maximumf %73, %72 : vector<1x256xf32>
    %75 = arith.subf %70, %74 : vector<1x256xf32>
    %76 = math.exp %75 : vector<1x256xf32>
    %77 = arith.subf %71, %74 : vector<1x256xf32>
    %78 = math.exp %77 : vector<1x256xf32>
    %79 = arith.subf %72, %74 : vector<1x256xf32>
    %80 = math.exp %79 : vector<1x256xf32>
    %81 = arith.addf %76, %78 : vector<1x256xf32>
    %82 = arith.addf %81, %80 : vector<1x256xf32>
    %83 = tpu.reciprocal %82 : vector<1x256xf32> -> vector<1x256xf32>
    %84 = arith.mulf %76, %83 : vector<1x256xf32>
    %85 = vector.broadcast %84 : vector<1x256xf32> to vector<25x256xf32>
    %86 = arith.mulf %85, %23 : vector<25x256xf32>
    %87 = arith.mulf %78, %83 : vector<1x256xf32>
    %88 = vector.broadcast %87 : vector<1x256xf32> to vector<25x256xf32>
    %89 = arith.mulf %88, %30 : vector<25x256xf32>
    %90 = arith.addf %86, %89 : vector<25x256xf32>
    %91 = arith.mulf %80, %83 : vector<1x256xf32>
    %92 = vector.broadcast %91 : vector<1x256xf32> to vector<25x256xf32>
    %93 = arith.mulf %92, %37 : vector<25x256xf32>
    %94 = arith.addf %90, %93 : vector<25x256xf32>
    %95 = vector.extract_strided_slice %3 {offsets = [4, 0], sizes = [1, 256], strides = [1, 1]} : vector<8x256xf32> to vector<1x256xf32>
    %96 = arith.addf %94, %57 : vector<25x256xf32>
    %97 = vector.broadcast %95 : vector<1x256xf32> to vector<25x256xf32>
    %98 = arith.mulf %97, %96 : vector<25x256xf32>
    %99 = vector.extract_strided_slice %3 {offsets = [5, 0], sizes = [1, 256], strides = [1, 1]} : vector<8x256xf32> to vector<1x256xf32>
    %100 = vector.broadcast %99 : vector<1x256xf32> to vector<25x256xf32>
    %101 = arith.addf %98, %100 : vector<25x256xf32>
    %102 = vector.extract_strided_slice %3 {offsets = [6, 0], sizes = [1, 256], strides = [1, 1]} : vector<8x256xf32> to vector<1x256xf32>
    %103 = vector.extract_strided_slice %6 {offsets = [0, 1664], sizes = [25, 256], strides = [1, 1]} : vector<25x1920xf32> to vector<25x256xf32>
    %104 = vector.broadcast %102 : vector<1x256xf32> to vector<25x256xf32>
    %105 = arith.mulf %104, %103 : vector<25x256xf32>
    %106 = vector.extract_strided_slice %3 {offsets = [7, 0], sizes = [1, 256], strides = [1, 1]} : vector<8x256xf32> to vector<1x256xf32>
    %107 = vector.broadcast %106 : vector<1x256xf32> to vector<25x256xf32>
    %108 = arith.addf %105, %107 : vector<25x256xf32>
    %109 = arith.addf %101, %108 : vector<25x256xf32>
    %cst_31 = arith.constant 0.000000e+00 : f32
    %110 = vector.broadcast %cst_31 : f32 to vector<25x256xf32>
    %111 = arith.maximumf %109, %110 : vector<25x256xf32>
    %c0_32 = arith.constant 0 : index
    %c0_33 = arith.constant 0 : index
    %c0_34 = arith.constant 0 : index
    %112 = vector.load %arg10[%c0_32, %c0_33, %c0_34] : memref<1x25x256xf32, #tpu.memory_space<vmem>>, vector<1x25x256xf32>
    %113 = vector.shape_cast %112 : vector<1x25x256xf32> to vector<25x256xf32>
    %114 = vector.shape_cast %111 : vector<25x256xf32> to vector<1x25x256xf32>
    tpu.vector_store %arg10[%c0_32, %c0_33, %c0_34], %114 {strides = array<i32>} : memref<1x25x256xf32, #tpu.memory_space<vmem>>, vector<1x25x256xf32>,
    return
  }
  func.func @transform_0(%arg0: i32) -> (i32, i32, i32) {
    %c0_i32 = arith.constant 0 : i32
    %c0_i32_0 = arith.constant 0 : i32
    %c0_i32_1 = arith.constant 0 : i32
    return %arg0, %c0_i32, %c0_i32_0 : i32, i32, i32
  }
  func.func @transform_1(%arg0: i32) -> (i32, i32) {
    %c0_i32 = arith.constant 0 : i32
    %c0_i32_0 = arith.constant 0 : i32
    %c0_i32_1 = arith.constant 0 : i32
    return %c0_i32, %c0_i32_0 : i32, i32
  }
  func.func @transform_2(%arg0: i32) -> (i32, i32, i32) {
    %c0_i32 = arith.constant 0 : i32
    %c0_i32_0 = arith.constant 0 : i32
    %c0_i32_1 = arith.constant 0 : i32
    %c0_i32_2 = arith.constant 0 : i32
    return %c0_i32, %c0_i32_0, %c0_i32_1 : i32, i32, i32
  }
  func.func @transform_3(%arg0: i32) -> (i32, i32) {
    %c0_i32 = arith.constant 0 : i32
    %c0_i32_0 = arith.constant 0 : i32
    %c0_i32_1 = arith.constant 0 : i32
    return %c0_i32, %c0_i32_0 : i32, i32
  }
  func.func @transform_4(%arg0: i32) -> (i32, i32) {
    %c0_i32 = arith.constant 0 : i32
    %c0_i32_0 = arith.constant 0 : i32
    %c0_i32_1 = arith.constant 0 : i32
    return %c0_i32, %c0_i32_0 : i32, i32
  }
  func.func @transform_5(%arg0: i32) -> (i32, i32) {
    %c0_i32 = arith.constant 0 : i32
    %c0_i32_0 = arith.constant 0 : i32
    %c0_i32_1 = arith.constant 0 : i32
    return %c0_i32, %c0_i32_0 : i32, i32
  }
  func.func @transform_6(%arg0: i32) -> (i32, i32) {
    %c0_i32 = arith.constant 0 : i32
    %c0_i32_0 = arith.constant 0 : i32
    %c0_i32_1 = arith.constant 0 : i32
    return %c0_i32, %c0_i32_0 : i32, i32
  }
  func.func @transform_7(%arg0: i32) -> (i32, i32) {
    %c0_i32 = arith.constant 0 : i32
    %c0_i32_0 = arith.constant 0 : i32
    %c0_i32_1 = arith.constant 0 : i32
    return %c0_i32, %c0_i32_0 : i32, i32
  }
  func.func @transform_8(%arg0: i32) -> (i32, i32) {
    %c0_i32 = arith.constant 0 : i32
    %c0_i32_0 = arith.constant 0 : i32
    %c0_i32_1 = arith.constant 0 : i32
    return %c0_i32, %c0_i32_0 : i32, i32
  }
  func.func @transform_9(%arg0: i32) -> (i32, i32, i32) {
    %c0_i32 = arith.constant 0 : i32
    %c0_i32_0 = arith.constant 0 : i32
    %c0_i32_1 = arith.constant 0 : i32
    return %arg0, %c0_i32, %c0_i32_0 : i32, i32, i32
  }
}

</mosaic_0001>

<bundles_post_ra>
// kernel: apply.1
= control target key start
LH: loop header
LB: loop body
LE: loop exit
PB: predicated region body
PF: predicated region fallthrough
CT: control target
= control target key end

     0   :  { %14 = vsyncpa [#allocation3], 0  ;;  %s3246_s30 = smov 0   ;;  %s4063_s0 = inlined_call_operand.vmem [shape: f32[2,25,48], index: 0, kind: input, shape index: {}]   ;;  %s4064_s1 = inlined_call_operand.hbm [shape: f32[48,1920], index: 1, kind: input, shape index: {}]   ;;  %s4065_s2 = inlined_call_operand.vmem [shape: f32[5,25,25], index: 2, kind: input, shape index: {}]   ;;  %s4066_s3 = inlined_call_operand.vmem [shape: f32[25,128], index: 3, kind: input, shape index: {}]   ;;  %s4067_s4 = inlined_call_operand.vmem [shape: f32[8,256], index: 4, kind: input, shape index: {}]   ;;  %s4068_s5 = inlined_call_operand.vmem [shape: f32[256,8], index: 5, kind: input, shape index: {}]   ;;  %s4069_s6 = inlined_call_operand.vmem [shape: f32[1,8], index: 6, kind: input, shape index: {}]   ;;  %s4070_s7 = inlined_call_operand.vmem [shape: f32[8,768], index: 7, kind: input, shape index: {}]   ;;  %s4071_s8 = inlined_call_operand.vmem [shape: f32[1,768], index: 8, kind: input, shape index: {}]   ;;  %s4072_s9 = inlined_call_operand.vmem [shape: f32[2,25,256], index: 9, kind: output, shape index: {}]  }
   0x1 LB: > { %s3252_s10 = sadd.s32 4294967295, %s3188_s30   ;;  %p2701_p0 = scmp.ge.s32.totalorder %s3188_s30, 1  ;;  %s3188_s30 = sphi %s3246_s30, %s20_s30  }
   0x2   : > { %p245_p1 = scmp.lt.s32.totalorder %s3188_s30, 3  ;;  %s3190_s11 = smov [#allocation2]  }
   0x3   : > { %s257_s12 = sshll.u32 %s3190_s11, 4  ;;  %p4073_p3 = scmp.eq.s32.totalorder %s3252_s10, 0  ;;  %s258_s12 = int_to_ptr.vmem [resolvable:$true] %s257_s12 }
   0x4   : > { %p3256_p2 = pnand %p2701_p0, %p245_p1  ;;  %s3150_s17 = scalar_lea.hbm %s4064_s1, 11520 }
   0x5   : > { %p3151_p6 = scmp.ne.s32.totalorder %s4064_s1, %s3150_s17  ;;  %p3157_p10 = scmp.lt.u32.totalorder %s3150_s17, %s4064_s1 }
   0x6   : > { %s4088_s13 = scalar_select %p3256_p2, 1, 0 }
   0x7   : > { %p3098_p4 = pneg %p3256_p2 }
   0x9   : > { %p3265_p5 = pnand %p4073_p3, %p3098_p4 }
   0xb   : > { %p3152_p7 = pneg %p3265_p5 }
   0xd   : > { %p3153_p8 = pnand %p3152_p7, %p3151_p6 }
   0xf   : > { %p3154_p9 = pneg %p3153_p8 }
  0x11   : > { %p3159_p11 = pnand %p3157_p10, %p3154_p9 }
  0x13   : > { %3162 = shalt.err (!%p3159_p11)
}
  0x14   : > { %s3163_s22 = scalar_lea.vmem %s258_s12, 11520  ;;  %p3171_p1 = scmp.lt.s32.totalorder %s258_s12, %s258_s12 }
  0x15   : > { %p3164_p12 = scmp.ne.s32.totalorder %s258_s12, %s3163_s22  ;;  %p3172_p4 = scmp.lt.s32.totalorder %s3163_s22, %s3163_s22 }
  0x17   : > { %p3166_p13 = pnand %p3164_p12, %p3152_p7  ;;  %p3173_p3 = por %p3172_p4, %p3171_p1 }
  0x19   : > { %p3167_p0 = pneg %p3166_p13 }
  0x1b   : > { %p3174_p2 = pnand %p3173_p3, %p3167_p0 }
  0x1d   : > { %3177 = shalt.err (!%p3174_p2)
}
  0x1e   : > { %s3191_s23 = smov 1920   ;;  %s3192_s24 = smov 120  }
  0x1f   : > { %3101 = dma.hbm_to_vmem [thread:$0]  (!%p3265_p5), %s4064_s1, 11520, %s258_s12, [#allocation3], %s3191_s23, %s3191_s23, %s3192_s24  }
  0x20   : > { %p4090_p6 = scmp.ne.s32.totalorder %s4088_s13, 0 }
  0x22   : > { %302 = sbr.rel (%p4090_p6) target bundleno = 1220 (0x4c4), region = 56 }
  0x29   : > { %p4091_p8 = scmp.eq.s32.totalorder %s3252_s10, 0 }
  0x2b   : > { %3183 = dma.done.wait (%p4091_p8), [#allocation3], 11520   ;;  %p4092_p7 = pmov %p4091_p8 }
  0x2c   : > { %v3193_v0 = vmov 0.0   ;;  %p338_p2 = scmp.lt.s32.totalorder %s3252_s10, 1  ;;  %v349_v1 = vld [vmem:[#allocation2 + $0x8] sm:$0xff]  ;;  %v364_v2 = vld [vmem:[#allocation2 + $0x80] sm:$0xff]  ;;  %v363_v5 = vld [vmem:[#allocation2 + $0x78] sm:$0xff]  ;;  %vm468_vm0 = vcmask 392192  }
  0x2d   : > { %3185 = vsyncadd (%p4092_p7), [#allocation3], 4294955776  ;;  %545 = vmatprep.mubr.f32.mxu0 %v3193_v0  ;;  %634 = vmatprep.mubr.f32.mxu1 %v3193_v0  ;;  %v348_v3 = vld [vmem:[#allocation2] sm:$0xff]  ;;  %v2878_v4 = vpack.c.bf16 %v364_v2, %v349_v1  ;;  %v379_v6 = vld [vmem:[#allocation2 + $0xf8] sm:$0xff]  ;;  %s3194_s16 = smov 64   ;;  %vm1202_vm1 = vcmask 1040384  }
  0x2e   : > { %v394_v7 = vld [vmem:[#allocation2 + $0x170] sm:$0xff]  ;;  %v2880_v8 = vpack.c.bf16 %v363_v5, %v348_v3  ;;  %v393_v11 = vld [vmem:[#allocation2 + $0x168] sm:$0xff]  ;;  %s4126_s10 = smov (!%p338_p2, %s3252_s10), 1  ;;  %v424_v13 = vld [vmem:[#allocation2 + $0x260] sm:$0xff]  ;;  %vm3195_vm2 = vmmov 1   ;;  %vm1189_vm4 = vcmask 203776  }
  0x2f   : > { %v2882_v9 = vpack.c.bf16 %v394_v7, %v379_v6  ;;  %v378_v10 = vld [vmem:[#allocation2 + $0xf0] sm:$0xff]  ;;  %v409_v12 = vld [vmem:[#allocation2 + $0x1e8] sm:$0xff]  ;;  %2879 = vmatprep.subr.bf16.mxu0 %v2878_v4  ;;  %v351_v14 = vld [vmem:[#allocation2 + $0x18] sm:$0xff]  ;;  %s2791_s27 = sshll.u32 %s4126_s10, 5  ;;  %vm1782_vm5 = vcmask 523264   ;;  %vm1893_vm7 = vcmask 196608  }
  0x30   : > { %v366_v15 = vld [vmem:[#allocation2 + $0x90] sm:$0xff]  ;;  %2881 = vmatpush1.bf16.msra.mxu0 %v2880_v8  ;;  %v2884_v16 = vpack.c.bf16 %v393_v11, %v378_v10  ;;  %v408_v18 = vld [vmem:[#allocation2 + $0x1e0] sm:$0xff]  ;;  %v2886_v20 = vpack.c.bf16 %v424_v13, %v409_v12  ;;  %v423_v21 = vld [vmem:[#allocation2 + $0x258] sm:$0xff]  ;;  %s3301_s11 = scalar_lea.vmem %s4063_s0, %s2791_s27  ;;  %vm2221_vm8 = vcmask 64512   ;;  %s2792_s12 = sshll.u32 %s4126_s10, 6 }
  0x31   : > { %v2890_v17 = vpack.c.bf16 %v366_v15, %v351_v14  ;;  %v350_v19 = vld [vmem:[#allocation2 + $0x10] sm:$0xff]  ;;  %2883 = vmatprep.subr.bf16.mxu0 %v2882_v9  ;;  %v365_v22 = vld [vmem:[#allocation2 + $0x88] sm:$0xff]  ;;  %v396_v25 = vld [vmem:[#allocation2 + $0x180] sm:$0xff]  ;;  %v2888_v31 = vpack.c.bf16 %v423_v21, %v408_v18  ;;  %s4031_s14 = scalar_lea.vmem %s4072_s9, %s2792_s12 }
  0x32   : > { %v381_v23 = vld [vmem:[#allocation2 + $0x108] sm:$0xff]  ;;  %v2892_v24 = vpack.c.bf16 %v365_v22, %v350_v19  ;;  %v380_v26 = vld [vmem:[#allocation2 + $0x100] sm:$0xff]  ;;  %v395_v27 = vld [vmem:[#allocation2 + $0x178] sm:$0xff] }
  0x33   : > { %2891 = vmatprep.subr.bf16.mxu1 %v2890_v17  ;;  %v2894_v28 = vpack.c.bf16 %v396_v25, %v381_v23  ;;  %v411_v29 = vld [vmem:[#allocation2 + $0x1f8] sm:$0xff]  ;;  %v426_v30 = vld [vmem:[#allocation2 + $0x270] sm:$0xff]  ;;  %v2896_v32 = vpack.c.bf16 %v395_v27, %v380_v26  ;;  %v353_v33 = vld [vmem:[#allocation2 + $0x28] sm:$0xff] }
  0x34   : > { %2885 = vmatpush1.bf16.msra.mxu0 %v2884_v16  ;;  %2893 = vmatpush1.bf16.msra.mxu1 %v2892_v24  ;;  %v368_v34 = vld [vmem:[#allocation2 + $0xa0] sm:$0xff]  ;;  %v2898_v35 = vpack.c.bf16 %v426_v30, %v411_v29  ;;  %v410_v37 = vld [vmem:[#allocation2 + $0x1f0] sm:$0xff]  ;;  %v425_v38 = vld [vmem:[#allocation2 + $0x268] sm:$0xff] }
  0x35   : > { %2887 = vmatprep.subr.bf16.mxu0 %v2886_v20  ;;  %2895 = vmatprep.subr.bf16.mxu1 %v2894_v28  ;;  %v2902_v36 = vpack.c.bf16 %v368_v34, %v353_v33  ;;  %v352_v39 = vld [vmem:[#allocation2 + $0x20] sm:$0xff]  ;;  %v367_v40 = vld [vmem:[#allocation2 + $0x98] sm:$0xff]  ;;  %v398_v42 = vld [vmem:[#allocation2 + $0x190] sm:$0xff]  ;;  %v2900_v44 = vpack.c.bf16 %v425_v38, %v410_v37 }
  0x36   : > { %v383_v41 = vld [vmem:[#allocation2 + $0x118] sm:$0xff]  ;;  %v3304_v43 = vld [vmem:[%s3301_s11] sm:$0xff]  ;;  %v2904_v46 = vpack.c.bf16 %v367_v40, %v352_v39  ;;  %v382_v47 = vld [vmem:[#allocation2 + $0x110] sm:$0xff] }
  0x37   : > { %v355_v45 = vld [vmem:[#allocation2 + $0x38] sm:$0xff]  ;;  %v397_v48 = vld [vmem:[#allocation2 + $0x188] sm:$0xff]  ;;  %v370_v49 = vld [vmem:[#allocation2 + $0xb0] sm:$0xff]  ;;  %v2906_v50 = vpack.c.bf16 %v398_v42, %v383_v41 }
  0x38   : > { %2889 = vmatpush1.bf16.msra.mxu0 %v2888_v31  ;;  %2897 = vmatpush1.bf16.msra.mxu1 %v2896_v32  ;;  %v413_v51 = vld [vmem:[#allocation2 + $0x208] sm:$0xff]  ;;  %v2914_v52 = vpack.c.bf16 %v370_v49, %v355_v45  ;;  %v354_v53 = vld [vmem:[#allocation2 + $0x30] sm:$0xff]  ;;  %v428_v55 = vld [vmem:[#allocation2 + $0x280] sm:$0xff]  ;;  %v2908_v59 = vpack.c.bf16 %v397_v48, %v382_v47 }
  0x39   : > { %2899 = vmatprep.subr.bf16.mxu1 %v2898_v35  ;;  %2903 = vmatprep.subr.bf16.mxu0 %v2902_v36  ;;  %v369_v54 = vld [vmem:[#allocation2 + $0xa8] sm:$0xff]  ;;  %v400_v57 = vld [vmem:[#allocation2 + $0x1a0] sm:$0xff]  ;;  %v427_v61 = vld [vmem:[#allocation2 + $0x278] sm:$0xff]  ;;  %v2910_v63 = vpack.c.bf16 %v428_v55, %v413_v51 }
  0x3a   : > { %v385_v56 = vld [vmem:[#allocation2 + $0x128] sm:$0xff]  ;;  %v412_v60 = vld [vmem:[#allocation2 + $0x200] sm:$0xff]  ;;  %v2916_v62 = vpack.c.bf16 %v369_v54, %v354_v53  ;;  %v399_v3 = vld [vmem:[#allocation2 + $0x198] sm:$0xff] }
  0x3b   : > { %2710 = vmatmul.mubr.msk.f32.vlgmr.msra.gmra.mrb[0].mxu0 %vm468_vm0, %v3304_v43  ;;  %v3310_v58 = vld [vmem:[%s3301_s11 + $0x8] sm:$0xff]  ;;  %v2918_v1 = vpack.c.bf16 %v400_v57, %v385_v56  ;;  %v384_v2 = vld [vmem:[#allocation2 + $0x120] sm:$0xff]  ;;  %v415_v4 = vld [vmem:[#allocation2 + $0x218] sm:$0xff]  ;;  %v2912_v9 = vpack.c.bf16 %v427_v61, %v412_v60 }
  0x3c   : > { %551 = vmatprep.mubr.f32.mxu0 %v3193_v0  ;;  %2901 = vmatpush1.bf16.msra.mxu1 %v2900_v44  ;;  %v430_v5 = vld [vmem:[#allocation2 + $0x290] sm:$0xff]  ;;  %v357_v6 = vld [vmem:[#allocation2 + $0x48] sm:$0xff]  ;;  %v372_v7 = vld [vmem:[#allocation2 + $0xc0] sm:$0xff]  ;;  %v2920_v10 = vpack.c.bf16 %v399_v3, %v384_v2 }
  0x3d   : > { %2905 = vmatpush1.bf16.msra.mxu0 %v2904_v46  ;;  %2915 = vmatprep.subr.bf16.mxu1 %v2914_v52  ;;  %v3318_v8 = vld [vmem:[%s3301_s11 + $0x10] sm:$0xff]  ;;  %v2922_v11 = vpack.c.bf16 %v430_v5, %v415_v4  ;;  %v2926_v12 = vpack.c.bf16 %v372_v7, %v357_v6  ;;  %v429_v14 = vld [vmem:[#allocation2 + $0x288] sm:$0xff]  ;;  %v359_v15 = vld [vmem:[#allocation2 + $0x58] sm:$0xff] }
  0x3e   : > { %2907 = vmatprep.subr.bf16.mxu0 %v2906_v50  ;;  %v414_v13 = vld [vmem:[#allocation2 + $0x210] sm:$0xff]  ;;  %v3327_v17 = vld [vmem:[%s3301_s11 + $0x18] sm:$0x1]  ;;  %v356_v19 = vld [vmem:[#allocation2 + $0x40] sm:$0xff] }
  0x3f   : > { %2711 = vmatmul.mubr.msk.f32.gmra.mrb[2].mxu0 %vm468_vm0, %v3310_v58  ;;  %2714 = vmatmul.mubr.msk.f32.vlgmr.msra.gmra.mrb[0].mxu1 %vm468_vm0, %v3304_v43  ;;  %v374_v16 = vld [vmem:[#allocation2 + $0xd0] sm:$0xff]  ;;  %v2924_v18 = vpack.c.bf16 %v429_v14, %v414_v13  ;;  %v371_v20 = vld [vmem:[#allocation2 + $0xb8] sm:$0xff]  ;;  %v401_v27 = vld [vmem:[#allocation2 + $0x1a8] sm:$0xff] }
  0x40   : > { %557 = vmatprep.mubr.f32.mxu0 %v3193_v0  ;;  %640 = vmatprep.mubr.f32.mxu1 %v3193_v0  ;;  %v387_v21 = vld [vmem:[#allocation2 + $0x138] sm:$0xff]  ;;  %v402_v22 = vld [vmem:[#allocation2 + $0x1b0] sm:$0xff]  ;;  %v2938_v23 = vpack.c.bf16 %v374_v16, %v359_v15  ;;  %v2928_v24 = vpack.c.bf16 %v371_v20, %v356_v19  ;;  %v417_v28 = vld [vmem:[#allocation2 + $0x228] sm:$0xff] }
  0x41   : > { %2909 = vmatpush1.bf16.msra.mxu0 %v2908_v59  ;;  %2917 = vmatpush1.bf16.msra.mxu1 %v2916_v62  ;;  %v2930_v25 = vpack.c.bf16 %v402_v22, %v387_v21  ;;  %v386_v26 = vld [vmem:[#allocation2 + $0x130] sm:$0xff]  ;;  %v432_v29 = vld [vmem:[#allocation2 + $0x2a0] sm:$0xff]  ;;  %v373_v31 = vld [vmem:[#allocation2 + $0xc8] sm:$0xff] }
  0x42   : > { %2911 = vmatprep.subr.bf16.mxu0 %v2910_v63  ;;  %2919 = vmatprep.subr.bf16.mxu1 %v2918_v1  ;;  %v358_v30 = vld [vmem:[#allocation2 + $0x50] sm:$0xff]  ;;  %v2932_v32 = vpack.c.bf16 %v401_v27, %v386_v26  ;;  %v2934_v33 = vpack.c.bf16 %v432_v29, %v417_v28  ;;  %v416_v34 = vld [vmem:[#allocation2 + $0x220] sm:$0xff]  ;;  %v431_v35 = vld [vmem:[#allocation2 + $0x298] sm:$0xff] }
  0x43   : > { %2712 = vmatmul.mubr.msk.f32.gmra.mrb[4].mxu0 %vm468_vm0, %v3318_v8  ;;  %2715 = vmatmul.mubr.msk.f32.gmra.mrb[2].mxu1 %vm468_vm0, %v3310_v58  ;;  %v2940_v36 = vpack.c.bf16 %v373_v31, %v358_v30  ;;  %v389_v37 = vld [vmem:[#allocation2 + $0x148] sm:$0xff]  ;;  %v404_v38 = vld [vmem:[#allocation2 + $0x1c0] sm:$0xff]  ;;  %v403_v40 = vld [vmem:[#allocation2 + $0x1b8] sm:$0xff]  ;;  %v2936_v44 = vpack.c.bf16 %v431_v35, %v416_v34 }
  0x44   : > { %563 = vmatprep.mubr.f32.mxu0 %v3193_v0  ;;  %646 = vmatprep.mubr.f32.mxu1 %v3193_v0  ;;  %v388_v39 = vld [vmem:[#allocation2 + $0x140] sm:$0xff]  ;;  %v361_v41 = vld [vmem:[#allocation2 + $0x68] sm:$0xff]  ;;  %v2942_v45 = vpack.c.bf16 %v404_v38, %v389_v37  ;;  %v419_v47 = vld [vmem:[#allocation2 + $0x238] sm:$0xff] }
  0x45   : > { %2913 = vmatpush1.bf16.msra.mxu0 %v2912_v9  ;;  %2921 = vmatpush1.bf16.msra.mxu1 %v2920_v10  ;;  %v376_v42 = vld [vmem:[#allocation2 + $0xe0] sm:$0xff]  ;;  %v2944_v46 = vpack.c.bf16 %v403_v40, %v388_v39  ;;  %v434_v48 = vld [vmem:[#allocation2 + $0x2b0] sm:$0xff]  ;;  %v433_v51 = vld [vmem:[#allocation2 + $0x2a8] sm:$0xff] }
  0x46   : > { %2923 = vmatprep.subr.bf16.mxu1 %v2922_v11  ;;  %2927 = vmatprep.subr.bf16.mxu0 %v2926_v12  ;;  %v2950_v49 = vpack.c.bf16 %v376_v42, %v361_v41  ;;  %v418_v50 = vld [vmem:[#allocation2 + $0x230] sm:$0xff]  ;;  %v2946_v52 = vpack.c.bf16 %v434_v48, %v419_v47  ;;  %v360_v54 = vld [vmem:[#allocation2 + $0x60] sm:$0xff]  ;;  %v375_v55 = vld [vmem:[#allocation2 + $0xd8] sm:$0xff] }
  0x47   : > { %2713 = vmatmul.mubr.msk.f32.gmra.mrb[6].mxu0 %vm468_vm0, %v3327_v17  ;;  %2716 = vmatmul.mubr.msk.f32.gmra.mrb[4].mxu1 %vm468_vm0, %v3318_v8  ;;  %v2948_v53 = vpack.c.bf16 %v433_v51, %v418_v50  ;;  %v391_v56 = vld [vmem:[#allocation2 + $0x158] sm:$0xff]  ;;  %v406_v57 = vld [vmem:[#allocation2 + $0x1d0] sm:$0xff]  ;;  %v2952_v59 = vpack.c.bf16 %v375_v55, %v360_v54  ;;  %v405_v62 = vld [vmem:[#allocation2 + $0x1c8] sm:$0xff] }
  0x48   : > { %723 = vmatprep.mubr.f32.mxu0 %v3193_v0  ;;  %652 = vmatprep.mubr.f32.mxu1 %v3193_v0  ;;  %v2954_v60 = vpack.c.bf16 %v406_v57, %v391_v56  ;;  %v390_v61 = vld [vmem:[#allocation2 + $0x150] sm:$0xff]  ;;  %v421_v63 = vld [vmem:[#allocation2 + $0x248] sm:$0xff]  ;;  %v436_v1 = vld [vmem:[#allocation2 + $0x2c0] sm:$0xff] }
  0x49   : > { %2925 = vmatpush1.bf16.msra.mxu1 %v2924_v18  ;;  %v2956_v2 = vpack.c.bf16 %v405_v62, %v390_v61  ;;  %v2958_v3 = vpack.c.bf16 %v436_v1, %v421_v63  ;;  %v420_v4 = vld [vmem:[#allocation2 + $0x240] sm:$0xff]  ;;  %v435_v5 = vld [vmem:[#allocation2 + $0x2b8] sm:$0xff]  ;;  %v362_v7 = vld [vmem:[#allocation2 + $0x70] sm:$0xff] }
  0x4a   : > { %2939 = vmatprep.subr.bf16.mxu1 %v2938_v23  ;;  %v2960_v6 = vpack.c.bf16 %v435_v5, %v420_v4  ;;  %v377_v9 = vld [vmem:[#allocation2 + $0xe8] sm:$0xff]  ;;  %v407_v11 = vld [vmem:[#allocation2 + $0x1d8] sm:$0xff]  ;;  %v422_v13 = vld [vmem:[#allocation2 + $0x250] sm:$0xff] }
  0x4b   : > { %2718 = vmatmul.mubr.msk.f32.vlgmr.msra.gmra.mrb[8].mxu0 %vm468_vm0, %v3304_v43  ;;  %2717 = vmatmul.mubr.msk.f32.gmra.mrb[6].mxu1 %vm468_vm0, %v3327_v17  ;;  %v2962_v10 = vpack.c.bf16 %v377_v9, %v362_v7  ;;  %v437_v14 = vld [vmem:[#allocation2 + $0x2c8] sm:$0xff]  ;;  %v458_v16 = vld [vmem:[%s4066_s3] sm:$0xff]  ;;  %vm3441_vm3 = vmpackc.low %vm1202_vm1, %vm3195_vm2 }
  0x4c   : > { %729 = vmatprep.mubr.f32.mxu0 %v3193_v0  ;;  %2929 = vmatpush1.bf16.msra.mxu0 %v2928_v24  ;;  %v2970_v15 = vpack.c.bf16 %v437_v14, %v422_v13  ;;  %v443_v14 = vld [vmem:[%s4065_s2 + $0x28] sm:$0xff]  ;;  %vm3528_vm6 = vmpackc.low %vm1782_vm5, %vm1782_vm5 }
  0x4d   : > { %812 = vmatprep.mubr.f32.mxu1 %v3193_v0  ;;  %2931 = vmatprep.subr.bf16.mxu0 %v2930_v25  ;;  %v460_v25 = vld [vmem:[%s4066_s3 + $0x10] sm:$0xff]  ;;  %v2097_v63 = vld [vmem:[%s4068_s5 + $0x88] sm:$0xff] }
  0x4f   : > { %2719 = vmatmul.mubr.msk.f32.gmra.mrb[10].mxu0 %vm468_vm0, %v3310_v58  ;;  %2722 = vmatmul.mubr.msk.f32.vlgmr.msra.gmra.mrb[8].mxu1 %vm468_vm0, %v3304_v43 }
  0x50   : > { %735 = vmatprep.mubr.f32.mxu0 %v3193_v0  ;;  %2933 = vmatpush1.bf16.msra.mxu0 %v2932_v32 }
  0x51   : > { %818 = vmatprep.mubr.f32.mxu1 %v3193_v0  ;;  %2935 = vmatprep.subr.bf16.mxu0 %v2934_v33  ;;  %v461_v33 = vld [vmem:[%s4066_s3 + $0x18] sm:$0x1] }
  0x52   : > { %2941 = vmatpush1.bf16.msra.mxu1 %v2940_v36 }
  0x53   : > { %2720 = vmatmul.mubr.msk.f32.gmra.mrb[12].mxu0 %vm468_vm0, %v3318_v8  ;;  %2723 = vmatmul.mubr.msk.f32.gmra.mrb[10].mxu1 %vm468_vm0, %v3310_v58 }
  0x54   : > { %741 = vmatprep.mubr.f32.mxu0 %v3193_v0  ;;  %2937 = vmatpush1.bf16.msra.mxu0 %v2936_v44 }
  0x55   : > { %824 = vmatprep.mubr.f32.mxu1 %v3193_v0  ;;  %2943 = vmatprep.subr.bf16.mxu1 %v2942_v45 }
  0x56   : > { %2945 = vmatpush1.bf16.msra.mxu1 %v2944_v46  ;;  %2951 = vmatprep.subr.bf16.mxu0 %v2950_v49 }
  0x57   : > { %2721 = vmatmul.mubr.msk.f32.gmra.mrb[14].mxu0 %vm468_vm0, %v3327_v17  ;;  %2724 = vmatmul.mubr.msk.f32.gmra.mrb[12].mxu1 %vm468_vm0, %v3318_v8 }
  0x58   : > { %901 = vmatprep.mubr.f32.mxu0 %v3193_v0  ;;  %830 = vmatprep.mubr.f32.mxu1 %v3193_v0 }
  0x59   : > { %2947 = vmatprep.subr.bf16.mxu1 %v2946_v52 }
  0x5a   : > { %2949 = vmatpush1.bf16.msra.mxu1 %v2948_v53 }
  0x5b   : > { %2726 = vmatmul.mubr.msk.f32.vlgmr.msra.gmra.mrb[16].mxu0 %vm468_vm0, %v3304_v43  ;;  %2725 = vmatmul.mubr.msk.f32.gmra.mrb[14].mxu1 %vm468_vm0, %v3327_v17 }
  0x5c   : > { %907 = vmatprep.mubr.f32.mxu0 %v3193_v0  ;;  %990 = vmatprep.mubr.f32.mxu1 %v3193_v0 }
  0x5d   : > { %2953 = vmatpush1.bf16.msra.mxu0 %v2952_v59  ;;  %2963 = vmatprep.subr.bf16.mxu1 %v2962_v10 }
  0x5e   : > { %2955 = vmatprep.subr.bf16.mxu0 %v2954_v60 }
  0x5f   : > { %2727 = vmatmul.mubr.msk.f32.gmra.mrb[18].mxu0 %vm468_vm0, %v3310_v58  ;;  %2730 = vmatmul.mubr.msk.f32.vlgmr.msra.gmra.mrb[16].mxu1 %vm468_vm0, %v3304_v43 }
  0x60   : > { %913 = vmatprep.mubr.f32.mxu0 %v3193_v0  ;;  %996 = vmatprep.mubr.f32.mxu1 %v3193_v0 }
  0x61   : > { %2957 = vmatpush1.bf16.msra.mxu0 %v2956_v2  ;;  %2965 = vmatpush3.bf16.msra.mxu1 %v2962_v10 }
  0x62   : > { %2959 = vmatprep.subr.bf16.mxu0 %v2958_v3 }
  0x63   : > { %2728 = vmatmul.mubr.msk.f32.gmra.mrb[20].mxu0 %vm468_vm0, %v3318_v8  ;;  %2731 = vmatmul.mubr.msk.f32.gmra.mrb[18].mxu1 %vm468_vm0, %v3310_v58 }
  0x64   : > { %919 = vmatprep.mubr.f32.mxu0 %v3193_v0  ;;  %1002 = vmatprep.mubr.f32.mxu1 %v3193_v0 }
  0x65   : > { %2961 = vmatpush1.bf16.msra.mxu0 %v2960_v6  ;;  %v442_v6 = vld [vmem:[%s4065_s2 + $0x20] sm:$0xff] }
  0x67   : > { %2729 = vmatmul.mubr.msk.f32.gmra.mrb[22].mxu0 %vm468_vm0, %v3327_v17  ;;  %2732 = vmatmul.mubr.msk.f32.gmra.mrb[20].mxu1 %vm468_vm0, %v3318_v8 }
  0x68   : > { %1008 = vmatprep.mubr.f32.mxu1 %v3193_v0  ;;  %1079 = vmatprep.mubr.f32.mxu0 %v3193_v0 }
  0x6b   : > { %2733 = vmatmul.mubr.msk.f32.gmra.mrb[22].mxu1 %vm468_vm0, %v3327_v17  ;;  %2734 = vmatmul.mubr.msk.f32.vlgmr.msra.gmra.mrb[24].mxu0 %vm468_vm0, %v3304_v43 }
  0x6c   : > { %1085 = vmatprep.mubr.f32.mxu0 %v3193_v0  ;;  %2858 = vmatprep.mubr.msk.f32.mxu1 %vm468_vm0, %v3304_v43  ;;  %v392_v43 = vld [vmem:[#allocation2 + $0x160] sm:$0xff] }
  0x6d   : > { %v2966_v12 = vpack.c.bf16 %v407_v11, %v392_v43 }
  0x6f   : > { %2735 = vmatmul.mubr.msk.f32.gmra.mrb[26].mxu0 %vm468_vm0, %v3310_v58  ;;  %2967 = vmatprep.subr.bf16.mxu1 %v2966_v12 }
  0x70   : > { %1091 = vmatprep.mubr.f32.mxu0 %v3193_v0  ;;  %2969 = vmatpush3.bf16.msra.mxu1 %v2966_v12 }
  0x71   : > { %2971 = vmatprep.subr.bf16.mxu1 %v2970_v15 }
  0x73   : > { %2736 = vmatmul.mubr.msk.f32.gmra.mrb[28].mxu0 %vm468_vm0, %v3318_v8 }
  0x74   : > { %1097 = vmatprep.mubr.f32.mxu0 %v3193_v0  ;;  %2973 = vmatpush3.bf16.msra.mxu1 %v2970_v15 }
  0x77   : > { %2737 = vmatmul.mubr.msk.f32.gmra.mrb[30].mxu0 %vm468_vm0, %v3327_v17  ;;  %2859 = vmatmul.mubr.msk.f32.vlgmr.msra.gmra.mrb[24].mxu1 %vm468_vm0, %v3310_v58  ;;  %v459_v58 = vld [vmem:[%s4066_s3 + $0x8] sm:$0xff] }
  0x78   : > { %1626 = vmatprep.mubr.f32.mxu0 %v3193_v0  ;;  %2861 = vmatprep.mubr.msk.f32.mxu1 %vm468_vm0, %v3318_v8 }
  0x7b   : > { %2862 = vmatmul.mubr.msk.f32.gmra.mrb[26].mxu1 %vm468_vm0, %v3327_v17 }
  0x7c   : > { %1273 = vmatprep.mubr.f32.mxu1 %v3193_v0 }
 0x10e   : > { %v547_v18 = vpop.f32.mrb[0].mxu0 }
 0x10f   : > { %v1766_v19 = vadd.f32 %v547_v18, %v458_v16  ;;  %v3410_v20 = vpop.f32.mrb[1].mxu0 }
 0x111   : > { %1774 = vrot.lane.b32.xlu0 %v1766_v19, %s3194_s16 }
 0x112   : > { %v553_v8 = vpop.f32.mrb[2].mxu0  ;;  %v636_v21 = vpop.f32.mrb[0].mxu1 }
 0x113   : > { %v1767_v22 = vadd.f32 %v553_v8, %v459_v58  ;;  %v3415_v17 = vpop.f32.mrb[3].mxu0  ;;  %v638_v23 = vpop.f32.mrb[1].mxu1  ;;  %v444_v8 = vld [vmem:[%s4065_s2 + $0x30] sm:$0xff] }
 0x114   : > { %v2986_v24 = vpack.c.bf16 %v3415_v17, %v3410_v20 }
 0x115   : > { %v3422_v26 = vpack.c.bf16 %v1767_v22, %v1766_v19  ;;  %1776 = vrot.lane.b32.xlu0 %v1767_v22, %s3194_s16 }
 0x116   : > { %v559_v27 = vpop.f32.mrb[4].mxu0  ;;  %v642_v28 = vpop.f32.mrb[2].mxu1 }
 0x117   : > { %v1768_v29 = vadd.f32 %v559_v27, %v460_v25  ;;  %v3424_v30 = vpop.f32.mrb[5].mxu0  ;;  %v2984_v31 = vpack.c.bf16 %v642_v28, %v636_v21  ;;  %v644_v32 = vpop.f32.mrb[3].mxu1  ;;  %v445_v27 = vld [vmem:[%s4065_s2 + $0x38] sm:$0x1] }
 0x118   : > { %v2976_v34 = vpack.c.bf16 %v644_v32, %v638_v23 }
 0x119   : > { %1778 = vrot.lane.b32.xlu1 %v1768_v29, %s3194_s16 }
 0x11a   : > { %v565_v35 = vpop.f32.mrb[6].mxu0  ;;  %v648_v36 = vpop.f32.mrb[4].mxu1 }
 0x11b   : > { %v1769_v37 = vadd.f32 %v565_v35, %v461_v33  ;;  %v567_v38 = vpop.f32.mrb[7].mxu0  ;;  %v650_v39 = vpop.f32.mrb[5].mxu1  ;;  %v450_v33 = vld [vmem:[%s4065_s2 + $0x60] sm:$0xff] }
 0x11c   : > { %v2991_v40 = vpack.c.bf16 %v567_v38, %v3424_v30  ;;  %v438_v35 = vld [vmem:[%s4065_s2] sm:$0xff] }
 0x11d   : > { %v3430_v41 = vpack.c.bf16 %v1769_v37, %v1768_v29  ;;  %1780 = vrot.lane.b32.xlu1 %v1769_v37, %s3194_s16 }
 0x11e   : > { %v725_v42 = vpop.f32.mrb[8].mxu0  ;;  %v654_v44 = vpop.f32.mrb[6].mxu1 }
 0x11f   : > { %v3432_v45 = vpop.f32.mrb[9].mxu0  ;;  %v2988_v46 = vpack.c.bf16 %v654_v44, %v648_v36  ;;  %v656_v47 = vpop.f32.mrb[7].mxu1  ;;  %v439_v44 = vld [vmem:[%s4065_s2 + $0x8] sm:$0xff] }
 0x120   : > { %v2981_v48 = vpack.c.bf16 %v656_v47, %v650_v39 }
 0x122   : > { %v731_v49 = vpop.f32.mrb[10].mxu0  ;;  %v814_v50 = vpop.f32.mrb[8].mxu1 }
 0x123   : > { %v2974_v51 = vpack.c.bf16 %v731_v49, %v725_v42  ;;  %v3434_v52 = vpop.f32.mrb[11].mxu0  ;;  %v816_v53 = vpop.f32.mrb[9].mxu1  ;;  %v451_v42 = vld [vmem:[%s4065_s2 + $0x68] sm:$0xff]  ;;  %v452_v49 = vld [vmem:[%s4065_s2 + $0x70] sm:$0xff] }
 0x124   : > { %v2996_v54 = vpack.c.bf16 %v3434_v52, %v3432_v45 }
 0x125   : > { %2975 = vmatprep.subr.bf16.mxu1 %v2974_v51 }
 0x126   : > { %v737_v55 = vpop.f32.mrb[12].mxu0  ;;  %2977 = vmatpush1.bf16.msra.mxu1 %v2976_v34  ;;  %v820_v56 = vpop.f32.mrb[10].mxu1 }
 0x127   : > { %v3438_v57 = vpop.f32.mrb[13].mxu0  ;;  %v2994_v59 = vpack.c.bf16 %v820_v56, %v814_v50  ;;  %v822_v60 = vpop.f32.mrb[11].mxu1  ;;  %v440_v50 = vld [vmem:[%s4065_s2 + $0x10] sm:$0xff] }
 0x128   : > { %v3006_v61 = vpack.c.bf16 %v822_v60, %v816_v53  ;;  %v453_v53 = vld [vmem:[%s4065_s2 + $0x78] sm:$0x1]  ;;  %v446_v60 = vld [vmem:[%s4065_s2 + $0x40] sm:$0xff] }
 0x12a   : > { %v743_v62 = vpop.f32.mrb[14].mxu0  ;;  %v3445_v1 = vpop.f32.mrb[12].mxu1 }
 0x12b   : > { %v2978_v2 = vpack.c.bf16 %v743_v62, %v737_v55  ;;  %v3447_v3 = vpop.f32.mrb[15].mxu0  ;;  %v828_v4 = vpop.f32.mrb[13].mxu1  ;;  %v455_v62 = vld [vmem:[%s4065_s2 + $0x88] sm:$0xff] }
 0x12c   : > { %v3001_v5 = vpack.c.bf16 %v3447_v3, %v3438_v57  ;;  %v457_v3 = vld [vmem:[%s4065_s2 + $0x98] sm:$0x1] }
 0x12d   : > { %2980 = vmatprep.subr.msk.bf16.mxu1 %vm3441_vm3, %v2978_v2  ;;  %v449_v2 = vld [vmem:[%s4065_s2 + $0x58] sm:$0x1] }
 0x12e   : > { %2983 = vmatpush1.bf16.msk.msra.mxu1 %vm3441_vm3, %v2981_v48  ;;  %v903_v7 = vpop.f32.mrb[16].mxu0  ;;  %v3458_v9 = vpop.f32.mrb[14].mxu1 }
 0x12f   : > { %2985 = vmatprep.subr.bf16.mxu1 %v2984_v31  ;;  %v905_v10 = vpop.f32.mrb[17].mxu0  ;;  %v2998_v43 = vpack.c.bf16 %v3458_v9, %v3445_v1  ;;  %v834_v11 = vpop.f32.mrb[15].mxu1  ;;  %v456_v1 = vld [vmem:[%s4065_s2 + $0x90] sm:$0xff] }
 0x130   : > { %v3011_v12 = vpack.c.bf16 %v834_v11, %v828_v4 }
 0x131   : > { %2744 = vmatmul.mubr.msk.f32.vlgmr.msra.gmra.mrb[28].mxu1 %vm1189_vm4, %v442_v6 }
 0x132   : > { %2987 = vmatpush1.bf16.msra.mxu1 %v2986_v24  ;;  %v909_v13 = vpop.f32.mrb[18].mxu0  ;;  %1279 = vmatprep.mubr.f32.mxu1 %v3193_v0  ;;  %v992_v15 = vpop.f32.mrb[16].mxu1 }
 0x133   : > { %2990 = vmatprep.subr.msk.bf16.mxu1 %vm3441_vm3, %v2988_v46  ;;  %v3004_v16 = vpack.c.bf16 %v909_v13, %v903_v7  ;;  %v911_v18 = vpop.f32.mrb[19].mxu0  ;;  %v3469_v19 = vpop.f32.mrb[17].mxu1  ;;  %v2080_v13 = vld [vmem:[%s4068_s5] sm:$0xff] }
 0x134   : > { %v3016_v20 = vpack.c.bf16 %v911_v18, %v905_v10  ;;  %v2099_v18 = vld [vmem:[%s4068_s5 + $0x98] sm:$0xff] }
 0x135   : > { %2745 = vmatmul.mubr.msk.f32.gmra.mrb[30].mxu1 %vm1189_vm4, %v443_v14  ;;  %3005 = vmatprep.subr.bf16.mxu0 %v3004_v16  ;;  %v2081_v14 = vld [vmem:[%s4068_s5 + $0x8] sm:$0xff]  ;;  %v2098_v16 = vld [vmem:[%s4068_s5 + $0x90] sm:$0xff] }
 0x136   : > { %2993 = vmatpush1.bf16.msk.msra.mxu1 %vm3441_vm3, %v2991_v40  ;;  %v915_v58 = vpop.f32.mrb[20].mxu0  ;;  %1285 = vmatprep.mubr.f32.mxu1 %v3193_v0  ;;  %v998_v21 = vpop.f32.mrb[18].mxu1 }
 0x137   : > { %v917_v22 = vpop.f32.mrb[21].mxu0  ;;  %3007 = vmatpush1.bf16.msra.mxu0 %v3006_v61  ;;  %v3014_v17 = vpack.c.bf16 %v998_v21, %v992_v15  ;;  %v3478_v23 = vpop.f32.mrb[19].mxu1  ;;  %2995 = vmatprep.subr.bf16.mxu1 %v2994_v59  ;;  %v454_v59 = vld [vmem:[%s4065_s2 + $0x80] sm:$0xff]  ;;  %v447_v61 = vld [vmem:[%s4065_s2 + $0x48] sm:$0xff]  ;;  %v3048_v15 = vpack.c.bf16 %v2081_v14, %v2080_v13 }
 0x138   : > { %v3038_v24 = vpack.c.bf16 %v3478_v23, %v3469_v19  ;;  %v3050_v19 = vpack.c.bf16 %v2099_v18, %v2098_v16  ;;  %v2100_v21 = vld [vmem:[%s4068_s5 + $0xa0] sm:$0xff]  ;;  %v3753_v13 = vld [vmem:[%s4067_s4 + $0x8] sm:$0xff] }
 0x139   : > { %2746 = vmatmul.mubr.msk.f32.gmra.mrb[32].mxu1 %vm1189_vm4, %v444_v8  ;;  %v2084_v23 = vld [vmem:[%s4068_s5 + $0x20] sm:$0xff] }
 0x13a   : > { %v921_v25 = vpop.f32.mrb[22].mxu0  ;;  %1291 = vmatprep.mubr.f32.mxu1 %v3193_v0  ;;  %v1004_v28 = vpop.f32.mrb[20].mxu1  ;;  %v3758_v14 = vld [vmem:[%s4067_s4] sm:$0xff] }
 0x13b   : > { %v3008_v29 = vpack.c.bf16 %v921_v25, %v915_v58  ;;  %v3487_v30 = vpop.f32.mrb[21].mxu1  ;;  %v923_v31 = vpop.f32.mrb[23].mxu0  ;;  %v2083_v58 = vld [vmem:[%s4068_s5 + $0x18] sm:$0xff] }
 0x13c   : > { %v3021_v32 = vpack.c.bf16 %v923_v31, %v917_v22  ;;  %v2101_v22 = vld [vmem:[%s4068_s5 + $0xa8] sm:$0xff]  ;;  %v2087_v31 = vld [vmem:[%s4068_s5 + $0x38] sm:$0xff] }
 0x13d   : > { %3010 = vmatprep.subr.msk.bf16.mxu0 %vm3441_vm3, %v3008_v29  ;;  %2747 = vmatmul.mubr.msk.f32.gmra.mrb[34].mxu1 %vm1189_vm4, %v445_v27  ;;  %v2102_v27 = vld [vmem:[%s4068_s5 + $0xb0] sm:$0xff] }
 0x13e   : > { %3013 = vmatpush1.bf16.msk.msra.mxu0 %vm3441_vm3, %v3011_v12  ;;  %v1010_v34 = vpop.f32.mrb[22].mxu1  ;;  %1380 = vmatprep.mubr.f32.mxu1 %v3193_v0  ;;  %v3501_v36 = vpop.f32.mrb[24].mxu0 }
 0x13f   : > { %3015 = vmatprep.subr.bf16.mxu0 %v3014_v17  ;;  %v3018_v37 = vpack.c.bf16 %v1010_v34, %v1004_v28  ;;  %v3503_v38 = vpop.f32.mrb[23].mxu1  ;;  %v3505_v39 = vpop.f32.mrb[25].mxu0  ;;  %v3054_v17 = vpack.c.bf16 %v2101_v22, %v2100_v21  ;;  %v2103_v28 = vld [vmem:[%s4068_s5 + $0xb8] sm:$0xff]  ;;  %v2105_v34 = vld [vmem:[%s4068_s5 + $0xc8] sm:$0xff] }
 0x140   : > { %v3043_v40 = vpack.c.bf16 %v3503_v38, %v3487_v30  ;;  %v3058_v29 = vpack.c.bf16 %v2103_v28, %v2102_v27  ;;  %v2086_v30 = vld [vmem:[%s4068_s5 + $0x30] sm:$0xff] }
 0x141   : > { %2762 = vmatmul.mubr.msk.f32.vlgmr.msra.gmra.mrb[32].mxu0 %vm1189_vm4, %v450_v33  ;;  %2750 = vmatmul.mubr.msk.f32.vlgmr.msra.gmra.mrb[28].mxu1 %vm1189_vm4, %v438_v35  ;;  %v2104_v33 = vld [vmem:[%s4068_s5 + $0xc0] sm:$0xff] }
 0x142   : > { %3017 = vmatpush1.bf16.msra.mxu0 %v3016_v20  ;;  %2997 = vmatpush1.bf16.msra.mxu1 %v2996_v54  ;;  %v1087_v46 = vpop.f32.mrb[26].mxu0  ;;  %v441_v54 = vld [vmem:[%s4065_s2 + $0x18] sm:$0x1]  ;;  %v2082_v20 = vld [vmem:[%s4068_s5 + $0x10] sm:$0xff]  ;;  %v3062_v35 = vpack.c.bf16 %v2105_v34, %v2104_v33 }
 0x143   : > { %1632 = vmatprep.mubr.f32.mxu0 %v3193_v0  ;;  %3020 = vmatprep.subr.msk.bf16.mxu0 %vm3441_vm3, %v3018_v37  ;;  %v3036_v47 = vpack.c.bf16 %v1087_v46, %v3501_v36  ;;  %v3524_v48 = vpop.f32.mrb[27].mxu0  ;;  %v3052_v8 = vpack.c.bf16 %v2083_v58, %v2082_v20  ;;  %v2088_v36 = vld [vmem:[%s4068_s5 + $0x40] sm:$0xff]  ;;  %v2089_v37 = vld [vmem:[%s4068_s5 + $0x48] sm:$0xff]  ;;  %v2090_v46 = vld [vmem:[%s4068_s5 + $0x50] sm:$0xff] }
 0x144   : > { %1386 = vmatprep.mubr.f32.mxu1 %v3193_v0  ;;  %3000 = vmatprep.subr.msk.bf16.mxu1 %vm3441_vm3, %v2998_v43  ;;  %v2096_v43 = vld [vmem:[%s4068_s5 + $0x80] sm:$0xff]  ;;  %v3064_v38 = vpack.c.bf16 %v2089_v37, %v2088_v36 }
 0x145   : > { %2763 = vmatmul.mubr.msk.f32.gmra.mrb[34].mxu0 %vm1189_vm4, %v451_v42  ;;  %2751 = vmatmul.mubr.msk.f32.gmra.mrb[30].mxu1 %vm1189_vm4, %v439_v44  ;;  %v3046_v12 = vpack.c.bf16 %v2097_v63, %v2096_v43  ;;  %v2107_v42 = vld [vmem:[%s4068_s5 + $0xd8] sm:$0xff] }
 0x146   : > { %3023 = vmatpush1.bf16.msk.msra.mxu0 %vm3441_vm3, %v3021_v32  ;;  %1638 = vmatprep.mubr.f32.mxu0 %v3193_v0  ;;  %v1093_v51 = vpop.f32.mrb[28].mxu0  ;;  %v3060_v32 = vpack.c.bf16 %v2087_v31, %v2086_v30 }
 0x147   : > { %3026 = vmatprep.subr.msk.bf16.mxu0 %vm3528_vm6, %v3422_v26  ;;  %3003 = vmatpush1.bf16.msk.msra.mxu1 %vm3441_vm3, %v3001_v5  ;;  %v3557_v52 = vpop.f32.mrb[29].mxu0 }
 0x148   : > { %1392 = vmatprep.mubr.f32.mxu1 %v3193_v0  ;;  %3047 = vmatprep.subr.bf16.mxu1 %v3046_v12 }
 0x149   : > { %2764 = vmatmul.mubr.msk.f32.gmra.mrb[36].mxu0 %vm1189_vm4, %v452_v49  ;;  %2752 = vmatmul.mubr.msk.f32.gmra.mrb[32].mxu1 %vm1189_vm4, %v440_v50  ;;  %v2108_v49 = vld [vmem:[%s4068_s5 + $0xe0] sm:$0xff]  ;;  %v2109_v50 = vld [vmem:[%s4068_s5 + $0xe8] sm:$0xff] }
 0x14a   : > { %1644 = vmatprep.mubr.f32.mxu0 %v3193_v0  ;;  %1398 = vmatprep.mubr.f32.mxu1 %v3193_v0  ;;  %v1099_v55 = vpop.f32.mrb[30].mxu0  ;;  %v3638_v7 = vpop.f32.mrb[24].mxu1 }
 0x14b   : > { %v3040_v56 = vpack.c.bf16 %v1099_v55, %v1093_v51  ;;  %v3570_v57 = vpop.f32.mrb[31].mxu0  ;;  %v3640_v9 = vpop.f32.mrb[25].mxu1  ;;  %v3070_v51 = vpack.c.bf16 %v2109_v50, %v2108_v49 }
 0x14d   : > { %2765 = vmatmul.mubr.msk.f32.gmra.mrb[38].mxu0 %vm1189_vm4, %v453_v53  ;;  %2753 = vmatmul.mubr.msk.f32.gmra.mrb[34].mxu1 %vm1189_vm4, %v441_v54  ;;  %v2092_v53 = vld [vmem:[%s4068_s5 + $0x60] sm:$0xff]  ;;  %v2093_v54 = vld [vmem:[%s4068_s5 + $0x68] sm:$0xff] }
 0x14e   : > { %1741 = vmatprep.mubr.f32.mxu0 %v3193_v0  ;;  %1487 = vmatprep.mubr.f32.mxu1 %v3193_v0  ;;  %v3642_v10 = vpop.f32.mrb[26].mxu1  ;;  %v3072_v55 = vpack.c.bf16 %v2093_v54, %v2092_v53 }
 0x14f   : > { %v3650_v11 = vpop.f32.mrb[27].mxu1 }
 0x151   : > { %2768 = vmatmul.mubr.msk.f32.vlgmr.msra.gmra.mrb[40].mxu0 %vm1189_vm4, %v454_v59  ;;  %2756 = vmatmul.mubr.msk.f32.vlgmr.msra.gmra.mrb[28].mxu1 %vm1189_vm4, %v446_v60  ;;  %v2111_v59 = vld [vmem:[%s4068_s5 + $0xf8] sm:$0xff]  ;;  %v2094_v60 = vld [vmem:[%s4068_s5 + $0x70] sm:$0xff] }
 0x152   : > { %3029 = vmatpush3.bf16.xpose.msk.msra.mxu0 %vm3528_vm6, %v3422_v26  ;;  %1493 = vmatprep.mubr.f32.mxu1 %v3193_v0  ;;  %v448_v26 = vld [vmem:[%s4065_s2 + $0x50] sm:$0xff] }
 0x153   : > { %3032 = vmatprep.subr.msk.bf16.mxu0 %vm3528_vm6, %v3430_v41  ;;  %1747 = vmatprep.mubr.f32.mxu0 %v3193_v0 }
 0x154   : > { %3049 = vmatpush3.bf16.msra.mxu1 %v3048_v15 }
 0x155   : > { %2757 = vmatmul.mubr.msk.f32.gmra.mrb[30].mxu1 %vm1189_vm4, %v447_v61  ;;  %2769 = vmatmul.mubr.msk.f32.gmra.mrb[42].mxu0 %vm1189_vm4, %v455_v62  ;;  %v2095_v62 = vld [vmem:[%s4068_s5 + $0x78] sm:$0xff] }
 0x156   : > { %1499 = vmatprep.mubr.f32.mxu1 %v3193_v0  ;;  %1753 = vmatprep.mubr.f32.mxu0 %v3193_v0 }
 0x157   : > { %3051 = vmatprep.subr.bf16.mxu1 %v3050_v19 }
 0x158   : > { %3053 = vmatpush3.bf16.msra.mxu1 %v3052_v8 }
 0x159   : > { %2758 = vmatmul.mubr.msk.f32.gmra.mrb[32].mxu1 %vm1189_vm4, %v448_v26  ;;  %2770 = vmatmul.mubr.msk.f32.gmra.mrb[44].mxu0 %vm1189_vm4, %v456_v1  ;;  %v3076_v26 = vpack.c.bf16 %v2095_v62, %v2094_v60 }
 0x15a   : > { %3035 = vmatpush3.bf16.xpose.msk.msra.mxu0 %vm3528_vm6, %v3430_v41  ;;  %1505 = vmatprep.mubr.f32.mxu1 %v3193_v0 }
 0x15b   : > { %1759 = vmatprep.mubr.f32.mxu0 %v3193_v0  ;;  %3037 = vmatprep.subr.bf16.mxu0 %v3036_v47  ;;  %v2091_v47 = vld [vmem:[%s4068_s5 + $0x58] sm:$0xff] }
 0x15c   : > { %3055 = vmatprep.subr.bf16.mxu1 %v3054_v17  ;;  %v3068_v45 = vpack.c.bf16 %v2091_v47, %v2090_v46 }
 0x15d   : > { %2759 = vmatmul.mubr.msk.f32.gmra.mrb[34].mxu1 %vm1189_vm4, %v449_v2  ;;  %2771 = vmatmul.mubr.msk.f32.gmra.mrb[46].mxu0 %vm1189_vm4, %v457_v3  ;;  %v1520_v3 = vlaneseq }
 0x183   : > { %v1775_v4 = vpop.permute.xlu0 %1774 }
 0x184   : > { %2872 = vmatprep.mubr.msk.f32.mxu0 %vm1782_vm5, %v1775_v4 }
 0x187   : > { %v1777_v41 = vpop.permute.xlu0 %1776 }
 0x188   : > { %2873 = vmatmul.mubr.msk.f32.vlgmr.msra.gmra.mrb[48].mxu0 %vm1782_vm5, %v1777_v41 }
 0x189   : > { %3039 = vmatpush1.bf16.msra.mxu0 %v3038_v24  ;;  %v2085_v24 = vld [vmem:[%s4068_s5 + $0x28] sm:$0xff] }
 0x18a   : > { %3042 = vmatprep.subr.msk.bf16.mxu0 %vm3441_vm3, %v3040_v56  ;;  %v3056_v25 = vpack.c.bf16 %v2085_v24, %v2084_v23  ;;  %v2110_v56 = vld [vmem:[%s4068_s5 + $0xf0] sm:$0xff] }
 0x18b   : > { %v1779_v5 = vpop.permute.xlu1 %1778  ;;  %v3074_v61 = vpack.c.bf16 %v2111_v59, %v2110_v56 }
 0x18c   : > { %2875 = vmatprep.mubr.msk.f32.mxu0 %vm1782_vm5, %v1779_v5  ;;  %3057 = vmatpush3.bf16.msra.mxu1 %v3056_v25  ;;  %v3742_v5 = vshrl.u32 %v1520_v3, 7 }
 0x18d   : > { %3045 = vmatpush1.bf16.msk.msra.mxu0 %vm3441_vm3, %v3043_v40  ;;  %3059 = vmatprep.subr.bf16.mxu1 %v3058_v29  ;;  %v2106_v40 = vld [vmem:[%s4068_s5 + $0xd0] sm:$0xff] }
 0x18e   : > { %v3066_v44 = vpack.c.bf16 %v2107_v42, %v2106_v40  ;;  %v3748_v12 = vsub.s32 0, %v3742_v5  ;;  %v3763_v18 = vsub.s32 2, %v3742_v5 }
 0x18f   : > { %v1781_v6 = vpop.permute.xlu1 %1780 }
 0x190   : > { %2876 = vmatmul.mubr.msk.f32.gmra.mrb[50].mxu0 %vm1782_vm5, %v1781_v6  ;;  %3061 = vmatpush3.bf16.msra.mxu1 %v3060_v32  ;;  %v3745_v6 = vsub.s32 1, %v3742_v5  ;;  %v1523_v20 = vrot.slane %v3758_v14, %v3748_v12  ;;  %v1527_v8 = vrot.slane %v3753_v13, %v3748_v12  ;;  %v1654_v17 = vrot.slane %v3758_v14, %v3763_v18 }
 0x191   : > { %2019 = vmatprep.mubr.f32.mxu0 %v3193_v0  ;;  %3063 = vmatprep.subr.bf16.mxu1 %v3062_v35  ;;  %v1658_v28 = vrot.slane %v3753_v13, %v3763_v18 }
 0x192   : > { %v1539_v15 = vrot.slane %v3758_v14, %v3745_v6  ;;  %v1543_v19 = vrot.slane %v3753_v13, %v3745_v6 }
 0x194   : > { %3065 = vmatpush3.bf16.msra.mxu1 %v3064_v38 }
 0x195   : > { %3067 = vmatprep.subr.bf16.mxu1 %v3066_v44 }
 0x198   : > { %3069 = vmatpush3.bf16.msra.mxu1 %v3068_v45 }
 0x199   : > { %3071 = vmatprep.subr.bf16.mxu1 %v3070_v51 }
 0x19c   : > { %3073 = vmatpush3.bf16.msra.mxu1 %v3072_v55 }
 0x19d   : > { %3075 = vmatprep.subr.bf16.mxu1 %v3074_v61 }
 0x1a0   : > { %3077 = vmatpush3.bf16.msra.mxu1 %v3076_v26 }
 0x214   : > { %v1628_v1 = vpop.f32.mrb[32].mxu0 }
 0x215   : > { %v1630_v2 = vpop.f32.mrb[33].mxu0  ;;  %v3771_v21 = vadd.f32 %v1628_v1, %v1539_v15 }
 0x216   : > { %v3775_v24 = vadd.f32 %v1630_v2, %v1543_v19 }
 0x218   : > { %v1634_v4 = vpop.f32.mrb[34].mxu0  ;;  %4097 = vst [vmem:[#allocation5_spill] sm:$0xff] %v3775_v24 }
 0x219   : > { %v1636_v41 = vpop.f32.mrb[35].mxu0  ;;  %v3783_v31 = vadd.f32 %v1634_v4, %v1539_v15 }
 0x21a   : > { %v3785_v32 = vadd.f32 %v1636_v41, %v1543_v19 }
 0x21c   : > { %v1640_v43 = vpop.f32.mrb[36].mxu0  ;;  %4099 = vst [vmem:[#allocation7_spill] sm:$0xff] %v3785_v32 }
 0x21d   : > { %v1642_v63 = vpop.f32.mrb[37].mxu0  ;;  %v3803_v49 = vadd.f32 %v1640_v43, %v1539_v15 }
 0x21e   : > { %v3807_v51 = vadd.f32 %v1642_v63, %v1543_v19 }
 0x220   : > { %v1646_v16 = vpop.f32.mrb[38].mxu0  ;;  %4103 = vst [vmem:[#allocation11_spill] sm:$0xff] %v3807_v51 }
 0x221   : > { %v1648_v58 = vpop.f32.mrb[39].mxu0  ;;  %v3823_v41 = vadd.f32 %v1646_v16, %v1539_v15 }
 0x222   : > { %v3827_v63 = vadd.f32 %v1648_v58, %v1543_v19 }
 0x224   : > { %v1489_v22 = vpop.f32.mrb[28].mxu1  ;;  %v1743_v23 = vpop.f32.mrb[40].mxu0  ;;  %4106 = vst [vmem:[#allocation14_spill] sm:$0xff] %v3827_v63 }
 0x225   : > { %v3777_v25 = vadd.f32 %v1523_v20, %v1489_v22  ;;  %v1491_v27 = vpop.f32.mrb[29].mxu1  ;;  %v1745_v29 = vpop.f32.mrb[41].mxu0  ;;  %v3789_v35 = vadd.f32 %v1743_v23, %v1654_v17 }
 0x226   : > { %v3781_v30 = vadd.f32 %v1527_v8, %v1491_v27  ;;  %v3795_v42 = vadd.f32 %v1745_v29, %v1658_v28 }
 0x227   : > { %v2044_v33 = vadd.f32 %v3771_v21, %v3777_v25 }
 0x228   : > { %4098 = vst [vmem:[#allocation6_spill] sm:$0xff] %v3781_v30  ;;  %v1495_v34 = vpop.f32.mrb[30].mxu1  ;;  %v1749_v36 = vpop.f32.mrb[42].mxu0  ;;  %v2045_v37 = vadd.f32 %v3775_v24, %v3781_v30  ;;  %4100 = vst [vmem:[#allocation8_spill] sm:$0xff] %v3795_v42 }
 0x229   : > { %v3793_v38 = vadd.f32 %v1523_v20, %v1495_v34  ;;  %v1497_v40 = vpop.f32.mrb[31].mxu1  ;;  %v3797_v44 = vadd.f32 %v1749_v36, %v1654_v17  ;;  %v1751_v46 = vpop.f32.mrb[43].mxu0  ;;  %v2052_v53 = vadd.f32 %v2044_v33, %v3789_v35 }
 0x22a   : > { %v3799_v47 = vadd.f32 %v1527_v8, %v1497_v40  ;;  %v3801_v45 = vadd.f32 %v1751_v46, %v1658_v28  ;;  %v2053_v59 = vadd.f32 %v2045_v37, %v3795_v42 }
 0x22b   : > { %v2046_v50 = vadd.f32 %v3783_v31, %v3793_v38 }
 0x22c   : > { %4101 = vst [vmem:[#allocation9_spill] sm:$0xff] %v3799_v47  ;;  %4102 = vst [vmem:[#allocation10_spill] sm:$0xff] %v3801_v45  ;;  %v2047_v54 = vadd.f32 %v3785_v32, %v3799_v47  ;;  %v1501_v55 = vpop.f32.mrb[32].mxu1  ;;  %v1755_v56 = vpop.f32.mrb[44].mxu0 }
 0x22d   : > { %v3813_v60 = vadd.f32 %v1523_v20, %v1501_v55  ;;  %v2054_v61 = vadd.f32 %v2046_v50, %v3797_v44  ;;  %v1503_v62 = vpop.f32.mrb[33].mxu1  ;;  %v3816_v26 = vadd.f32 %v1755_v56, %v1654_v17  ;;  %v1757_v1 = vpop.f32.mrb[45].mxu0 }
 0x22e   : > { %v3818_v2 = vadd.f32 %v1527_v8, %v1503_v62  ;;  %v2055_v3 = vadd.f32 %v2047_v54, %v3801_v45  ;;  %v3821_v4 = vadd.f32 %v1757_v1, %v1658_v28 }
 0x22f   : > { %v2048_v43 = vadd.f32 %v3803_v49, %v3813_v60  ;;  %v2060_v22 = vadd.f32 %v2054_v61, %v2052_v53 }
 0x230   : > { %4104 = vst [vmem:[#allocation12_spill] sm:$0xff] %v3818_v2  ;;  %4105 = vst [vmem:[#allocation13_spill] sm:$0xff] %v3821_v4  ;;  %v2049_v23 = vadd.f32 %v3807_v51, %v3818_v2  ;;  %v1507_v27 = vpop.f32.mrb[34].mxu1  ;;  %v1761_v29 = vpop.f32.mrb[46].mxu0  ;;  %v2070_v33 = vadd.f32 %v2055_v3, %v2053_v59 }
 0x231   : > { %v3831_v34 = vadd.f32 %v1523_v20, %v1507_v27  ;;  %v2056_v36 = vadd.f32 %v2048_v43, %v3816_v26  ;;  %v1509_v37 = vpop.f32.mrb[35].mxu1  ;;  %v3834_v40 = vadd.f32 %v1761_v29, %v1654_v17  ;;  %v1763_v15 = vpop.f32.mrb[47].mxu0 }
 0x232   : > { %v3836_v16 = vadd.f32 %v1527_v8, %v1509_v37  ;;  %v2057_v19 = vadd.f32 %v2049_v23, %v3821_v4  ;;  %v3839_v58 = vadd.f32 %v1763_v15, %v1658_v28 }
 0x233   : > { %4107 = vst [vmem:[#allocation15_spill] sm:$0xff] %v3834_v40  ;;  %v2050_v46 = vadd.f32 %v3823_v41, %v3831_v34  ;;  %v2061_v50 = vadd.f32 %v2060_v22, %v2056_v36 }
 0x234   : > { %4108 = vst [vmem:[#allocation16_spill] sm:$0xff] %v3836_v16  ;;  %4109 = vst [vmem:[#allocation17_spill] sm:$0xff] %v3839_v58  ;;  %v2051_v20 = vadd.f32 %v3827_v63, %v3836_v16  ;;  %v2071_v53 = vadd.f32 %v2070_v33, %v2057_v19 }
 0x235   : > { %v2058_v54 = vadd.f32 %v2050_v46, %v3834_v40 }
 0x236   : > { %v2059_v17 = vadd.f32 %v2051_v20, %v3839_v58 }
 0x237   : > { %v2062_v55 = vsel %vm1202_vm1, %v2058_v54, 0.0 }
 0x238   : > { %v2063_v8 = vadd.f32 %v2062_v55, %v2061_v50  ;;  %v2072_v56 = vsel %vm1202_vm1, %v2059_v17, 0.0  ;;  %v2188_v17 = vld [vmem:[%s4070_s7 + $0x28] sm:$0xff]  ;;  %v2187_v55 = vld [vmem:[%s4070_s7 + $0x20] sm:$0xff] }
 0x239   : > { %v2073_v59 = vadd.f32 %v2072_v56, %v2071_v53  ;;  %2367 = vmatprep.subr.mxu1 %v2188_v17 }
 0x23a   : > { %v2064_v28 = vrot.slane %v2063_v8, 4 }
 0x23b   : > { %v2074_v61 = vrot.slane %v2073_v59, 4 }
 0x23c   : > { %v2065_v62 = vadd.f32 %v2064_v28, %v2063_v8 }
 0x23d   : > { %v2075_v1 = vadd.f32 %v2074_v61, %v2073_v59 }
 0x23e   : > { %v2066_v3 = vrot.slane %v2065_v62, 2 }
 0x23f   : > { %v2076_v43 = vrot.slane %v2075_v1, 2 }
 0x240   : > { %v2067_v22 = vadd.f32 %v2066_v3, %v2065_v62 }
 0x241   : > { %v2077_v23 = vadd.f32 %v2076_v43, %v2075_v1 }
 0x242   : > { %v2068_v27 = vrot.slane %v2067_v22, 1 }
 0x243   : > { %v2078_v29 = vrot.slane %v2077_v23, 1 }
 0x244   : > { %v2069_v33 = vadd.f32 %v2068_v27, %v2067_v22 }
 0x245   : > { %v2079_v36 = vadd.f32 %v2078_v29, %v2077_v23 }
 0x247   : > { %2177 = vmatprep.mubr.f32.mxu1 %v2079_v36 }
 0x248   : > { %2178 = vmatmul.mubr.f32.vlgmr.msra.gmra.mrb[36].mxu1 %v2069_v33 }
 0x249   : > { %2431 = vmatprep.mubr.f32.mxu1 %v3193_v0  ;;  %2368 = vmatpush1.msra.mxu1 %v2187_v55 }
 0x25b   : > { %v2874_v37 = vpop.f32.mrb[48].mxu0 }
 0x25c   : > { %v1865_v15 = vpop.f32.mrb[49].mxu0  ;;  %v1887_v19 = vsel %vm1189_vm4, %v2874_v37, -inf }
 0x25d   : > { %1888 = vmax.xlane.f32.xlu1 %v1887_v19  ;;  %v1884_v46 = vsel %vm1189_vm4, %v1865_v15, -inf }
 0x25e   : > { %1885 = vmax.xlane.f32.xlu0 %v1884_v46 }
 0x263   : > { %v2877_v50 = vpop.f32.mrb[50].mxu0 }
 0x264   : > { %v1875_v20 = vpop.f32.mrb[51].mxu0  ;;  %v1894_v54 = vsel %vm1893_vm7, %v2877_v50, -inf }
 0x265   : > { %v1890_v53 = vsel %vm1189_vm4, %v1875_v20, -inf }
 0x266   : > { %1891 = vmax.xlane.f32.xlu0 %v1890_v53 }
 0x26a   : > { %1895 = vmax.xlane.f32.xlu0 %v1894_v54  ;;  %v2112_v54 = vld [vmem:[%s4069_s6] sm:$0x1] }
 0x2ea   : > { %v1889_v8 = vpop.xlane.xlu1 %1888 }
 0x2eb   : > { %v1898_v56 = vsub.f32 %v2874_v37, %v1889_v8  ;;  %v1886_v59 = vpop.xlane.xlu0 %1885 }
 0x2ec   : > { %v1897_v28 = vsub.f32 %v1865_v15, %v1886_v59 }
 0x2ed   : > { %v1903_v61 = vmul.f32 1.442695, %v1898_v56 }
 0x2ee   : > { %v1901_v62 = vmul.f32 1.442695, %v1897_v28 }
 0x2ef   : > { %3118 = vpow2.f32 %v1903_v61 }
 0x2f0   : > { %3120 = vpow2.f32 %v1901_v62 }
 0x2f3   : > { %v1892_v1 = vpop.xlane.xlu0 %1891 }
 0x2f4   : > { %v1899_v3 = vsub.f32 %v1875_v20, %v1892_v1 }
 0x2f6   : > { %v1905_v43 = vmul.f32 1.442695, %v1899_v3  ;;  %v2183_v3 = vld [vmem:[%s4070_s7] sm:$0xff] }
 0x2f7   : > { %v1896_v22 = vpop.xlane.xlu0 %1895 }
 0x2f8   : > { %3122 = vpow2.f32 %v1905_v43  ;;  %v1900_v23 = vsub.f32 %v2877_v50, %v1896_v22  ;;  %v2184_v50 = vld [vmem:[%s4070_s7 + $0x8] sm:$0xff]  ;;  %v2186_v22 = vld [vmem:[%s4070_s7 + $0x18] sm:$0xff] }
 0x2f9   : > { %v3119_v27 = vpop.eup %3118  ;;  %2225 = vmatprep.subr.mxu0 %v2184_v50 }
 0x2fa   : > { %v3121_v29 = vpop.eup %3120  ;;  %v1907_v33 = vmul.f32 1.442695, %v1900_v23  ;;  %v1912_v36 = vsel %vm1189_vm4, %v3119_v27, 0.0 }
 0x2fb   : > { %1913 = vadd.xlane.f32.xlu0 %v1912_v36  ;;  %v1909_v37 = vsel %vm1189_vm4, %v3121_v29, 0.0 }
 0x2fc   : > { %3124 = vpow2.f32 %v1907_v33  ;;  %1910 = vadd.xlane.f32.xlu1 %v1909_v37 }
 0x302   : > { %v3123_v15 = vpop.eup %3122 }
 0x303   : > { %v1915_v19 = vsel %vm1189_vm4, %v3123_v15, 0.0 }
 0x304   : > { %1916 = vadd.xlane.f32.xlu1 %v1915_v19 }
 0x306   : > { %v3125_v46 = vpop.eup %3124 }
 0x307   : > { %v1918_v20 = vsel %vm1893_vm7, %v3125_v46, 0.0 }
 0x308   : > { %1919 = vadd.xlane.f32.xlu0 %v1918_v20 }
 0x31b   : > { %v2843_v53 = vpop.f32.mrb[36].mxu1 }
 0x31c   : > { %v2844_v17 = vpop.f32.mrb[37].mxu1 }
 0x31d   : > { %v2845_v55 = vadd.f32 %v2844_v17, %v2843_v53 }
 0x31f   : > { %v2180_v8 = vadd.f32 %v2845_v55, %v2112_v54 }
 0x321   : > { %2788 = vmatmul.mubr.msk.f32.vlgmr.msra.gmra.mrb[38].mxu1 %vm2221_vm8, %v2180_v8 }
 0x388   : > { %v1914_v56 = vpop.xlane.xlu0 %1913 }
 0x389   : > { %v1911_v59 = vpop.xlane.xlu1 %1910 }
 0x38a   : > { %3126 = vrcp.f32 %v1911_v59  ;;  %v3914_v59 = vsub.s32 5, %v3742_v5 }
 0x38b   : > { %3128 = vrcp.f32 %v1914_v56 }
 0x391   : > { %v1917_v28 = vpop.xlane.xlu1 %1916 }
 0x392   : > { %3130 = vrcp.f32 %v1917_v28  ;;  %v3917_v28 = vsub.s32 3, %v3742_v5 }
 0x394   : > { %v3127_v61 = vpop.eup %3126 }
 0x395   : > { %v1925_v62 = vmul.f32 %v3127_v61, %v3121_v29  ;;  %v1920_v1 = vpop.xlane.xlu0 %1919  ;;  %v3129_v43 = vpop.eup %3128 }
 0x396   : > { %3132 = vrcp.f32 %v1920_v1  ;;  %v1926_v23 = vmul.f32 %v3129_v43, %v3119_v27  ;;  %v2185_v27 = vld [vmem:[%s4070_s7 + $0x10] sm:$0xff] }
 0x397   : > { %2782 = vmatmul.mubr.msk.f32.vlgmr.msra.gmra.mrb[52].mxu0 %vm1189_vm4, %v1925_v62 }
 0x398   : > { %2226 = vmatpush1.msra.mxu0 %v2183_v3  ;;  %2025 = vmatprep.mubr.f32.mxu0 %v3193_v0 }
 0x399   : > { %2296 = vmatprep.subr.mxu0 %v2186_v22 }
 0x39b   : > { %2783 = vmatmul.mubr.msk.f32.gmra.mrb[54].mxu0 %vm1189_vm4, %v1926_v23 }
 0x39c   : > { %v3131_v29 = vpop.eup %3130  ;;  %2031 = vmatprep.mubr.f32.mxu0 %v3193_v0 }
 0x39d   : > { %v1927_v33 = vmul.f32 %v3131_v29, %v3123_v15 }
 0x39f   : > { %2784 = vmatmul.mubr.msk.f32.gmra.mrb[56].mxu0 %vm1189_vm4, %v1927_v33 }
 0x3a0   : > { %v3133_v36 = vpop.eup %3132  ;;  %2037 = vmatprep.mubr.f32.mxu0 %v3193_v0 }
 0x3a1   : > { %v1928_v37 = vmul.f32 %v3133_v36, %v3125_v46 }
 0x3a3   : > { %2785 = vmatmul.mubr.msk.f32.gmra.mrb[58].mxu0 %vm1189_vm4, %v1928_v37 }
 0x3a4   : > { %2289 = vmatprep.mubr.f32.mxu0 %v3193_v0 }
 0x3a7   : > { %2786 = vmatmul.mubr.msk.f32.vlgmr.msra.gmra.mrb[60].mxu0 %vm2221_vm8, %v2180_v8 }
 0x3a8   : > { %2297 = vmatpush1.msra.mxu0 %v2185_v27  ;;  %2360 = vmatprep.mubr.f32.mxu0 %v3193_v0  ;;  %v3908_v0 = vsub.s32 4, %v3742_v5 }
 0x3ab   : > { %2787 = vmatmul.mubr.msk.f32.vlgmr.msra.gmra.mrb[62].mxu0 %vm2221_vm8, %v2180_v8  ;;  %v2189_v8 = vld [vmem:[%s4071_s8] sm:$0x3f] }
 0x3ac   : > { %v2194_v62 = vrot.slane %v2189_v8, %v3748_v12  ;;  %v2202_v3 = vrot.slane %v2189_v8, %v3763_v18  ;;  %v2198_v43 = vrot.slane %v2189_v8, %v3745_v6  ;;  %v2206_v22 = vrot.slane %v2189_v8, %v3917_v28 }
 0x3ad   : > { %v2210_v23 = vrot.slane %v2189_v8, %v3908_v0  ;;  %v2214_v29 = vrot.slane %v2189_v8, %v3914_v59 }
 0x3f4   : > { %v2433_v15 = vpop.f32.mrb[38].mxu1 }
 0x3f5   : > { %v2435_v19 = vpop.f32.mrb[39].mxu1  ;;  %v2434_v45 = vadd.f32 %v2433_v15, %v2210_v23 }
 0x3f6   : > { %v2436_v63 = vadd.f32 %v2435_v19, %v2214_v29  ;;  %v2578_v19 = vsub.s32 6, %v3742_v5  ;;  %v1932_v29 = vrot.slane %v3758_v14, %v3917_v28 }
 0x46a   : > { %v3891_v20 = vpop.f32.mrb[52].mxu0 }
 0x46b   : > { %v3893_v46 = vpop.f32.mrb[53].mxu0 }
 0x46e   : > { %v3895_v50 = vpop.f32.mrb[54].mxu0 }
 0x46f   : > { %v3897_v53 = vpop.f32.mrb[55].mxu0 }
 0x472   : > { %v3899_v54 = vpop.f32.mrb[56].mxu0 }
 0x473   : > { %v3901_v17 = vpop.f32.mrb[57].mxu0 }
 0x476   : > { %v3903_v55 = vpop.f32.mrb[58].mxu0 }
 0x477   : > { %v3905_v56 = vpop.f32.mrb[59].mxu0 }
 0x478   : > { %4110 = vst [vmem:[#allocation18_spill] sm:$0xff] %v3905_v56 }
 0x47a   : > { %v2291_v61 = vpop.f32.mrb[60].mxu0 }
 0x47b   : > { %v2293_v1 = vpop.f32.mrb[61].mxu0  ;;  %v2292_v36 = vadd.f32 %v2291_v61, %v2194_v62 }
 0x47c   : > { %v2294_v58 = vadd.f32 %v2293_v1, %v2198_v43 }
 0x47e   : > { %v2362_v33 = vpop.f32.mrb[62].mxu0 }
 0x47f   : > { %v2363_v37 = vadd.f32 %v2362_v33, %v2202_v3  ;;  %v2364_v27 = vpop.f32.mrb[63].mxu0 }
 0x480   : > { %v2365_v4 = vadd.f32 %v2364_v27, %v2206_v22  ;;  %v2583_v22 = vrot.slane %v3753_v13, %v2578_v19 }
 0x481   : > { %v2438_v42 = vmax.f32 %v2292_v36, %v2363_v37 }
 0x482   : > { %v2439_v51 = vmax.f32 %v2294_v58, %v2365_v4  ;;  %v3959_v27 = vmul.f32 %v2583_v22, %v3650_v11 }
 0x483   : > { %v2440_v32 = vmax.f32 %v2438_v42, %v2434_v45 }
 0x484   : > { %v2441_v18 = vmax.f32 %v2439_v51, %v2436_v63 }
 0x485   : > { %v2442_v24 = vsub.f32 %v2292_v36, %v2440_v32  ;;  %v2448_v6 = vsub.f32 %v2363_v37, %v2440_v32  ;;  %v2454_v16 = vsub.f32 %v2434_v45, %v2440_v32  ;;  %v3953_v36 = vmul.f32 %v2583_v22, %v3640_v9 }
 0x486   : > { %v2443_v2 = vsub.f32 %v2294_v58, %v2441_v18  ;;  %v2449_v47 = vsub.f32 %v2365_v4, %v2441_v18  ;;  %v2455_v30 = vsub.f32 %v2436_v63, %v2441_v18  ;;  %v3956_v37 = vmul.f32 %v3642_v10, %v2583_v22 }
 0x487   : > { %v2444_v56 = vmul.f32 1.442695, %v2442_v24  ;;  %v2450_v8 = vmul.f32 1.442695, %v2448_v6  ;;  %v2456_v40 = vmul.f32 1.442695, %v2454_v16  ;;  %v2579_v16 = vrot.slane %v3758_v14, %v2578_v19 }
 0x488   : > { %v2446_v61 = vmul.f32 1.442695, %v2443_v2  ;;  %v2452_v62 = vmul.f32 1.442695, %v2449_v47  ;;  %v2458_v15 = vmul.f32 1.442695, %v2455_v30  ;;  %v2547_v6 = vrot.slane %v3758_v14, %v3908_v0 }
 0x489   : > { %3134 = vpow2.f32 %v2444_v56  ;;  %v2594_v2 = vsub.s32 7, %v3742_v5  ;;  %v2586_v1 = vmul.f32 %v2579_v16, %v3524_v48  ;;  %v2588_v3 = vmul.f32 %v2579_v16, %v3557_v52 }
 0x48a   : > { %3136 = vpow2.f32 %v2450_v8  ;;  %v2590_v43 = vmul.f32 %v2579_v16, %v3570_v57  ;;  %v1936_v52 = vrot.slane %v3753_v13, %v3917_v28  ;;  %v3950_v57 = vmul.f32 %v3638_v7, %v2583_v22 }
 0x48b   : > { %3138 = vpow2.f32 %v2456_v40  ;;  %v2584_v40 = vmul.f32 %v2579_v16, %v3505_v39  ;;  %v2595_v56 = vrot.slane %v3758_v14, %v2594_v2  ;;  %v3945_v48 = vrot.slane %v3753_v13, %v2594_v2 }
 0x48c   : > { %3140 = vpow2.f32 %v2446_v61  ;;  %v3965_v8 = vrot.slane %v3753_v13, %v3908_v0  ;;  %v3969_v7 = vrot.slane %v3758_v14, %v3914_v59  ;;  %v3973_v9 = vrot.slane %v3753_v13, %v3914_v59 }
 0x48d   : > { %3142 = vpow2.f32 %v2452_v62  ;;  %v3934_v23 = vadd.f32 %v2595_v56, %v2584_v40  ;;  %v3936_v5 = vadd.f32 %v2595_v56, %v2586_v1  ;;  %v3940_v33 = vadd.f32 %v2595_v56, %v2588_v3  ;;  %v4112_v40 = vld [vmem:[#allocation18_spill] sm:$0xff] }
 0x48e   : > { %3144 = vpow2.f32 %v2458_v15  ;;  %v3942_v39 = vadd.f32 %v2595_v56, %v2590_v43  ;;  %v2022_v10 = vadd.f32 %v3891_v20, %v1932_v29  ;;  %v3977_v62 = vadd.f32 %v3893_v46, %v1936_v52  ;;  %v4113_v3 = vld [vmem:[#allocation6_spill] sm:$0xff]  ;;  %v4114_v43 = vld [vmem:[#allocation9_spill] sm:$0xff] }
 0x48f   : > { %v2028_v15 = vadd.f32 %v3895_v50, %v1932_v29  ;;  %v3981_v0 = vadd.f32 %v3897_v53, %v1936_v52  ;;  %v2034_v14 = vadd.f32 %v3899_v54, %v1932_v29  ;;  %v2040_v46 = vadd.f32 %v3903_v55, %v1932_v29  ;;  %v4115_v29 = vld [vmem:[#allocation12_spill] sm:$0xff] }
 0x493   : > { %v3135_v42 = vpop.eup %3134 }
 0x494   : > { %v3137_v51 = vpop.eup %3136 }
 0x495   : > { %v3139_v32 = vpop.eup %3138  ;;  %v2460_v45 = vadd.f32 %v3137_v51, %v3135_v42 }
 0x496   : > { %v3141_v4 = vpop.eup %3140 }
 0x497   : > { %v3143_v63 = vpop.eup %3142  ;;  %v2462_v24 = vadd.f32 %v3139_v32, %v2460_v45  ;;  %v3985_v45 = vadd.f32 %v3901_v17, %v1936_v52 }
 0x498   : > { %v2461_v47 = vadd.f32 %v3143_v63, %v3141_v4  ;;  %v3145_v58 = vpop.eup %3144 }
 0x499   : > { %3146 = vrcp.f32 %v2462_v24 }
 0x49a   : > { %v2463_v30 = vadd.f32 %v3145_v58, %v2461_v47 }
 0x49c   : > { %3148 = vrcp.f32 %v2463_v30 }
 0x4a3   : > { %v3147_v18 = vpop.eup %3146 }
 0x4a4   : > { %v2466_v11 = vmul.f32 %v3147_v18, %v3135_v42  ;;  %v2484_v28 = vmul.f32 %v3147_v18, %v3137_v51  ;;  %v2510_v61 = vmul.f32 %v3147_v18, %v3139_v32 }
 0x4a6   : > { %v3149_v19 = vpop.eup %3148  ;;  %v2471_v13 = vrot.slane %v2466_v11, %v3748_v12  ;;  %v2489_v20 = vrot.slane %v2484_v28, %v3748_v12  ;;  %v2515_v59 = vrot.slane %v2510_v61, %v3748_v12  ;;  %v4116_v11 = vld [vmem:[#allocation16_spill] sm:$0xff] }
 0x4a7   : > { %v2467_v42 = vmul.f32 %v3149_v19, %v3141_v4  ;;  %v2485_v51 = vmul.f32 %v3149_v19, %v3143_v63  ;;  %v2511_v50 = vmul.f32 %v3149_v19, %v3145_v58  ;;  %v4111_v63 = vld [vmem:[#allocation15_spill] sm:$0xff] }
 0x4a8   : > { %v2476_v53 = vmul.f32 %v2471_v13, %v3777_v25  ;;  %v2478_v32 = vmul.f32 %v2471_v13, %v3793_v38  ;;  %v2480_v54 = vmul.f32 %v2471_v13, %v3813_v60  ;;  %v2482_v17 = vmul.f32 %v2471_v13, %v3831_v34 }
 0x4a9   : > { %v2494_v24 = vmul.f32 %v2489_v20, %v3771_v21  ;;  %v2496_v16 = vmul.f32 %v2489_v20, %v3783_v31  ;;  %v2498_v2 = vmul.f32 %v2489_v20, %v3803_v49  ;;  %v2500_v47 = vmul.f32 %v2489_v20, %v3823_v41  ;;  %v4117_v20 = vld [vmem:[#allocation5_spill] sm:$0xff] }
 0x4aa   : > { %v2520_v55 = vmul.f32 %v2515_v59, %v3789_v35  ;;  %v2522_v4 = vmul.f32 %v2515_v59, %v3797_v44  ;;  %v2524_v25 = vmul.f32 %v2515_v59, %v3816_v26  ;;  %v2526_v38 = vmul.f32 %v2515_v59, %v4111_v63 }
 0x4ab   : > { %v2502_v58 = vadd.f32 %v2494_v24, %v2476_v53  ;;  %v2504_v60 = vadd.f32 %v2496_v16, %v2478_v32  ;;  %v2506_v30 = vadd.f32 %v2498_v2, %v2480_v54  ;;  %v2508_v34 = vadd.f32 %v2500_v47, %v2482_v17  ;;  %v4120_v53 = vld [vmem:[#allocation14_spill] sm:$0xff] }
 0x4ac   : > { %v2042_v21 = vadd.f32 %v4112_v40, %v1936_v52  ;;  %v2475_v31 = vrot.slane %v2467_v42, %v3748_v12  ;;  %v2493_v49 = vrot.slane %v2485_v51, %v3748_v12  ;;  %v2519_v41 = vrot.slane %v2511_v50, %v3748_v12  ;;  %v4118_v12 = vld [vmem:[#allocation7_spill] sm:$0xff] }
 0x4ad   : > { %v2528_v56 = vadd.f32 %v2520_v55, %v2502_v58  ;;  %v2530_v35 = vadd.f32 %v2522_v4, %v2504_v60  ;;  %v2532_v1 = vadd.f32 %v2524_v25, %v2506_v30  ;;  %v2534_v44 = vadd.f32 %v2526_v38, %v2508_v34  ;;  %v4119_v51 = vld [vmem:[#allocation11_spill] sm:$0xff]  ;;  %v4121_v25 = vld [vmem:[#allocation8_spill] sm:$0xff]  ;;  %v4122_v38 = vld [vmem:[#allocation10_spill] sm:$0xff] }
 0x4ae   : > { %v2477_v26 = vmul.f32 %v2475_v31, %v4113_v3  ;;  %v2479_v22 = vmul.f32 %v2475_v31, %v4114_v43  ;;  %v2481_v18 = vmul.f32 %v2475_v31, %v4115_v29  ;;  %v2483_v28 = vmul.f32 %v2475_v31, %v4116_v11  ;;  %v4123_v60 = vld [vmem:[#allocation13_spill] sm:$0xff] }
 0x4af   : > { %v2536_v61 = vadd.f32 %v2528_v56, %v2022_v10  ;;  %v2538_v52 = vadd.f32 %v2530_v35, %v2028_v15  ;;  %v2540_v19 = vadd.f32 %v2532_v1, %v2034_v14  ;;  %v2542_v13 = vadd.f32 %v2534_v44, %v2040_v46 }
 0x4b0   : > { %v2495_v59 = vmul.f32 %v2493_v49, %v4117_v20  ;;  %v2497_v42 = vmul.f32 %v2493_v49, %v4118_v12  ;;  %v2499_v50 = vmul.f32 %v2493_v49, %v4119_v51  ;;  %v2501_v32 = vmul.f32 %v2493_v49, %v4120_v53 }
 0x4b1   : > { %v2552_v54 = vmul.f32 %v2547_v6, %v2536_v61  ;;  %v2554_v17 = vmul.f32 %v2547_v6, %v2538_v52  ;;  %v2556_v24 = vmul.f32 %v2547_v6, %v2540_v19  ;;  %v2558_v16 = vmul.f32 %v2547_v6, %v2542_v13  ;;  %v4124_v6 = vld [vmem:[#allocation17_spill] sm:$0xff] }
 0x4b2   : > { %v2503_v2 = vadd.f32 %v2495_v59, %v2477_v26  ;;  %v2505_v47 = vadd.f32 %v2497_v42, %v2479_v22  ;;  %v2507_v55 = vadd.f32 %v2499_v50, %v2481_v18  ;;  %v2509_v10 = vadd.f32 %v2501_v32, %v2483_v28 }
 0x4b3   : > { %v2568_v15 = vadd.f32 %v3969_v7, %v2552_v54  ;;  %v2570_v14 = vadd.f32 %v3969_v7, %v2554_v17  ;;  %v2572_v46 = vadd.f32 %v3969_v7, %v2556_v24  ;;  %v2574_v4 = vadd.f32 %v3969_v7, %v2558_v16 }
 0x4b4   : > { %v2521_v63 = vmul.f32 %v2519_v41, %v4121_v25  ;;  %v2523_v58 = vmul.f32 %v2519_v41, %v4122_v38  ;;  %v2525_v30 = vmul.f32 %v2519_v41, %v4123_v60  ;;  %v2527_v34 = vmul.f32 %v2519_v41, %v4124_v6 }
 0x4b5   : > { %v2608_v40 = vadd.f32 %v3934_v23, %v2568_v15  ;;  %v2610_v31 = vadd.f32 %v3936_v5, %v2570_v14  ;;  %v2612_v49 = vadd.f32 %v3940_v33, %v2572_v46  ;;  %v2614_v56 = vadd.f32 %v3942_v39, %v2574_v4 }
 0x4b6   : > { %v2529_v7 = vadd.f32 %v2521_v63, %v2503_v2  ;;  %v2531_v35 = vadd.f32 %v2523_v58, %v2505_v47  ;;  %v2533_v41 = vadd.f32 %v2525_v30, %v2507_v55  ;;  %v2535_v1 = vadd.f32 %v2527_v34, %v2509_v10 }
 0x4b7   : > { %v2616_v23 = vmax.f32 %v2608_v40, 0.0  ;;  %v2618_v44 = vmax.f32 %v2610_v31, 0.0  ;;  %v2620_v5 = vmax.f32 %v2612_v49, 0.0  ;;  %v2622_v3 = vmax.f32 %v2614_v56, 0.0 }
 0x4b8   : > { %v2537_v33 = vadd.f32 %v2529_v7, %v3977_v62  ;;  %v2539_v39 = vadd.f32 %v2531_v35, %v3981_v0  ;;  %v2541_v26 = vadd.f32 %v2533_v41, %v3985_v45  ;;  %v2543_v43 = vadd.f32 %v2535_v1, %v2042_v21 }
 0x4b9   : > { %2624 = vst [vmem:[%s4031_s14] sm:$0xff] %v2616_v23  ;;  %2626 = vst [vmem:[%s4031_s14 + $0x10] sm:$0xff] %v2618_v44  ;;  %v2603_v62 = vadd.f32 %v3945_v48, %v3950_v57  ;;  %v2601_v0 = vadd.f32 %v3945_v48, %v3953_v36  ;;  %v2607_v45 = vadd.f32 %v3945_v48, %v3956_v37 }
 0x4ba   : > { %2628 = vst [vmem:[%s4031_s14 + $0x20] sm:$0xff] %v2620_v5  ;;  %2630 = vst [vmem:[%s4031_s14 + $0x30] sm:$0x1] %v2622_v3  ;;  %v2553_v22 = vmul.f32 %v3965_v8, %v2537_v33  ;;  %v2555_v29 = vmul.f32 %v3965_v8, %v2539_v39  ;;  %v2557_v18 = vmul.f32 %v3965_v8, %v2541_v26 }
 0x4bb   : > { %v2559_v11 = vmul.f32 %v3965_v8, %v2543_v43  ;;  %v2605_v21 = vadd.f32 %v3945_v48, %v3959_v27 }
 0x4bc   : > { %v2569_v28 = vadd.f32 %v3973_v9, %v2553_v22  ;;  %v2571_v8 = vadd.f32 %v3973_v9, %v2555_v29  ;;  %v2573_v61 = vadd.f32 %v3973_v9, %v2557_v18 }
 0x4bd   : > { %v2575_v57 = vadd.f32 %v3973_v9, %v2559_v11 }
 0x4be   : > { %v2609_v52 = vadd.f32 %v2601_v0, %v2569_v28  ;;  %v2611_v19 = vadd.f32 %v2603_v62, %v2571_v8  ;;  %v2613_v36 = vadd.f32 %v2605_v21, %v2573_v61 }
 0x4bf   : > { %v2615_v13 = vadd.f32 %v2607_v45, %v2575_v57 }
 0x4c0   : > { %v2617_v20 = vmax.f32 %v2609_v52, 0.0  ;;  %v2619_v59 = vmax.f32 %v2611_v19, 0.0  ;;  %v2621_v37 = vmax.f32 %v2613_v36, 0.0 }
 0x4c1   : > { %v2623_v12 = vmax.f32 %v2615_v13, 0.0 }
 0x4c2   : > { %2625 = vst [vmem:[%s4031_s14 + $0x8] sm:$0xff] %v2617_v20  ;;  %2627 = vst [vmem:[%s4031_s14 + $0x18] sm:$0xff] %v2619_v59 }
 0x4c3   : > { %2629 = vst [vmem:[%s4031_s14 + $0x28] sm:$0xff] %v2621_v37  ;;  %2631 = vst [vmem:[%s4031_s14 + $0x38] sm:$0x1] %v2623_v12 }
 0x4c4 PF: > { %s20_s30 = sadd.s32 1, %s3188_s30  }
 0x4c5   : > { %p17_p3 = scmp.ge.s32.totalorder %s20_s30, 4  }
 0x4c7   :  { %19 = sbr.rel (!%p17_p3) target bundleno = 1 (0x1), region = 91 }
 0x4ce   :  { %2653 = vsyncpa [#allocation3], 1 }
 0x4cf   :  { %2655 = vsyncpa [#allocation3 + $0x1], 1 }

</bundles_post_ra>
